<compile_context>
chip_gen: v5e
topology: v5e:2x2
jax: 0.10.0
libtpu: 0.0.40
codegen_flags: <defaults>
</compile_context>

<pallas_src>
import functools

import jax
import jax.numpy as jnp
import numpy as np
from jax.experimental import pallas as pl
from jax.experimental.pallas import tpu as pltpu

LRELU_SLOPE = 0.1
DILATIONS = (1, 3, 5)
K = 3                                    # kernel_size
RF = sum(d + 1 for d in DILATIONS)       # 12: full-block receptive field / side
MAXPAD = max(DILATIONS)                  # 5: largest single-conv reach
ALIGN = 128                              # lane-aligned offset of the window in padbuf


def _leaky(v):
    return jnp.where(v >= 0, v, v * LRELU_SLOPE)


def resblock1_kernel(xc_ref, xl_ref, xr_ref, w1_ref, b1_ref, w2_ref, b2_ref,
                     o_ref, padbuf, *, total_t):
    """One (batch, time-tile) grid step.

    xc_ref : (1, C, TT)        centre input tile (NCW)
    xl_ref : (1, C, HB)        last HB columns of the previous tile (clamped)
    xr_ref : (1, C, HB)        first HB columns of the next tile (clamped)
    w1_ref : (3, K, C, C)      convs1 per-tap weights, bf16 (w[s,k] = W_s[:,:,k])
    b1_ref : (3, C, 1)         convs1 biases, f32
    w2_ref : (3, K, C, C)      convs2 per-tap weights (dilation 1), bf16
    b2_ref : (3, C, 1)         convs2 biases, f32
    o_ref  : (1, C, TT)        output tile
    padbuf : (C, ALIGN+W+8)    bf16 conv-input scratch; window at lane offset ALIGN
    """
    C = xc_ref.shape[1]
    TT = xc_ref.shape[2]
    HB = xl_ref.shape[2]
    W = TT + 2 * RF
    A = ALIGN
    t = pl.program_id(1)

    # Zero the +/-MAXPAD guard ring around the extended window (10 columns).
    # The [A, A+W) band is fully rewritten by every conv, so nothing else
    # needs initialisation.
    padbuf[:, A - MAXPAD:A] = jnp.zeros((C, MAXPAD), padbuf.dtype)
    padbuf[:, A + W:A + W + MAXPAD] = jnp.zeros((C, MAXPAD), padbuf.dtype)

    # Extended window = global columns [t*TT - RF, t*TT + TT + RF).  Halo
    # columns come from the neighbouring tiles; at the sequence edges the
    # clamped neighbour holds irrelevant data, zeroed by the mask below.
    x = jnp.concatenate(
        [xl_ref[0, :, HB - RF:HB].astype(jnp.float32),
         xc_ref[0].astype(jnp.float32),
         xr_ref[0, :, :RF].astype(jnp.float32)], axis=1)           # (C, W) f32

    # Columns whose global position is outside [0, total_t) must read as zero
    # in *every* conv input — this reproduces PyTorch's per-conv "same"
    # zero padding at the sequence boundaries exactly.
    gpos = jax.lax.broadcasted_iota(jnp.int32, (1, W), 1) + (t * TT - RF)
    in_range = (gpos >= 0) & (gpos < total_t)                      # (1, W)

    def conv1d(pre, w_ref, b_ref, s, d):
        # Fused leaky_relu + boundary mask + bf16 cast, one lane-aligned store.
        padbuf[:, A:A + W] = jnp.where(in_range, _leaky(pre),
                                       0.0).astype(padbuf.dtype)
        # K = 3 accumulating MXU dots (taps at offsets -d, 0, +d); f32 acc.
        acc = jnp.dot(w_ref[s, 0], padbuf[:, A - d:A - d + W],
                      preferred_element_type=jnp.float32)
        acc = acc + jnp.dot(w_ref[s, 1], padbuf[:, A:A + W],
                            preferred_element_type=jnp.float32)
        acc = acc + jnp.dot(w_ref[s, 2], padbuf[:, A + d:A + d + W],
                            preferred_element_type=jnp.float32)
        return acc + b_ref[s]                                      # (C,1) bias

    # Three (leaky -> dilated conv -> leaky -> conv -> residual) stages,
    # recomputed on the full extended window (halo shrinks by d+1 per stage,
    # exactly consuming RF = 12 by the end).
    for s in range(3):
        xt = conv1d(x, w1_ref, b1_ref, s, DILATIONS[s])
        xt = conv1d(xt, w2_ref, b2_ref, s, 1)
        x = xt + x

    # Only the central TT columns are valid for this tile.
    o_ref[0] = x[:, RF:RF + TT].astype(o_ref.dtype)


def _vmem_budget_bytes():
    try:
        cap = pltpu.get_tpu_info().vmem_capacity_bytes
    except Exception:
        cap = 64 * 1024 * 1024          # conservative (v7x physical VMEM)
    return int(cap * 3 // 4)            # headroom for compiler-internal scratch


def _choose_time_tile(T, budget_bytes):
    if T <= 2048:
        return T                        # single tile (covers the test shape)
    target = 1024 if budget_bytes < 56 * (1 << 20) else 2048   # tighter on v7x
    for tt in (target, 1024, 512, 256, 128):
        if tt <= T and T % tt == 0:
            return tt
    return T                            # awkward T: fall back to one full tile


def resblock1_pallas(x_nct, w1t, b1, w2t, b2, *, single_buffer_weights=True):
    B, C, T = x_nct.shape
    assert T >= RF, f"T={T} must be >= receptive field {RF}"
    budget = _vmem_budget_bytes()
    TT = _choose_time_tile(T, budget)
    assert T % TT == 0
    nT = T // TT
    HB = 128 if TT % 128 == 0 else TT   # halo-fetch block width (lane rule)
    R = TT // HB                        # HB-blocks per time tile
    n_hblk = T // HB
    W = TT + 2 * RF
    PW = ALIGN + W + 8                  # left guard (128) + window + right guard

    def const_spec(shape):
        idx = lambda b, t, _n=len(shape): (0,) * _n
        if single_buffer_weights:
            # Weights/biases never change across the grid -> one VMEM buffer.
            return pl.BlockSpec(shape, idx, pipeline_mode=pl.Buffered(1))
        return pl.BlockSpec(shape, idx)

    kernel = functools.partial(resblock1_kernel, total_t=T)

    return pl.pallas_call(
        kernel,
        out_shape=jax.ShapeDtypeStruct((B, C, T), x_nct.dtype),
        grid_spec=pltpu.PrefetchScalarGridSpec(
            num_scalar_prefetch=0,
            grid=(B, nT),
            in_specs=[
                # centre tile
                pl.BlockSpec((1, C, TT), lambda b, t: (b, 0, t)),
                # left halo: last HB columns of the previous tile (clamped)
                pl.BlockSpec((1, C, HB),
                             lambda b, t: (b, 0, jnp.maximum(t * R - 1, 0))),
                # right halo: first HB columns of the next tile (clamped)
                pl.BlockSpec((1, C, HB),
                             lambda b, t: (b, 0,
                                           jnp.minimum((t + 1) * R, n_hblk - 1))),
                const_spec((3, K, C, C)),   # convs1 per-tap weights (bf16)
                const_spec((3, C, 1)),      # convs1 biases (f32)
                const_spec((3, K, C, C)),   # convs2 per-tap weights (bf16)
                const_spec((3, C, 1)),      # convs2 biases (f32)
            ],
            out_specs=pl.BlockSpec((1, C, TT), lambda b, t: (b, 0, t)),
            scratch_shapes=[pltpu.VMEM((C, PW), jnp.bfloat16)],
        ),
        compiler_params=pltpu.CompilerParams(
            dimension_semantics=("parallel", "parallel"),
            vmem_limit_bytes=budget),
    )(x_nct, x_nct, x_nct, w1t, b1, w2t, b2)


@functools.partial(jax.jit, static_argnames=("single_buffer_weights",))
def resblock1(x_nct, w1, b1, w2, b2, single_buffer_weights=True):
    """x_nct: (B, C, T) NCW; w*: (3, C_out, C_in, K) PyTorch layout; b*: (3, C)."""
    # Per-tap weight matrices w_t[s, k, o, i] = w[s, o, i, k]; bf16 operands for
    # the MXU (accumulation stays f32 inside the kernel).  I/O dtype follows x.
    w1t = jnp.transpose(w1, (0, 3, 1, 2)).astype(jnp.bfloat16)
    w2t = jnp.transpose(w2, (0, 3, 1, 2)).astype(jnp.bfloat16)
    b1r = b1[..., None].astype(jnp.float32)
    b2r = b2[..., None].astype(jnp.float32)
    return resblock1_pallas(x_nct, w1t, b1r, w2t, b2r,
                            single_buffer_weights=single_buffer_weights)


# ----------------------------- pure-JAX reference -----------------------------
def _conv1d_ref(x_nct, w_oik, bias, d):
    out = jax.lax.conv_general_dilated(
        x_nct, w_oik, window_strides=(1,), padding=[(d, d)],
        rhs_dilation=(d,), dimension_numbers=('NCH', 'OIH', 'NCH'))
    return out + bias[None, :, None]


def resblock1_ref(x_nct, w1, b1, w2, b2):
    x = x_nct
    for s in range(3):
        xt = jnp.where(x >= 0, x, x * LRELU_SLOPE)
        xt = _conv1d_ref(xt, w1[s], b1[s], DILATIONS[s])
        xt = jnp.where(xt >= 0, xt, xt * LRELU_SLOPE)
        xt = _conv1d_ref(xt, w2[s], b2[s], 1)
        x = xt + x
    return x


# ------------------------------------ main ------------------------------------
if __name__ == "__main__":
    B, C, T = 2, 4, 16  # small test shapes: batch=2, channels=4, time=16

    key = jax.random.PRNGKey(0)
    kx, kw1, kb1, kw2, kb2 = jax.random.split(key, 5)

    x = jax.random.normal(kx, (B, C, T), dtype=jnp.float32)

    # init_weights: normal(mean=0, std=0.01); weight_norm is identity at init.
    # Stored as (stage, C_out, C_in, K) = PyTorch Conv1d weight layout.
    w1 = 0.01 * jax.random.normal(kw1, (3, C, C, K), dtype=jnp.float32)
    w2 = 0.01 * jax.random.normal(kw2, (3, C, C, K), dtype=jnp.float32)
    bound = 1.0 / np.sqrt(C * K)  # PyTorch Conv1d bias init range
    b1 = jax.random.uniform(kb1, (3, C), jnp.float32, -bound, bound)
    b2 = jax.random.uniform(kb2, (3, C), jnp.float32, -bound, bound)

    try:
        out = jax.block_until_ready(
            resblock1(x, w1, b1, w2, b2, single_buffer_weights=True))
    except Exception:
        # Fallback for JAX builds where pl.Buffered(1) single-buffering of
        # constant operands is not supported in top-level pallas_call.
        out = jax.block_until_ready(
            resblock1(x, w1, b1, w2, b2, single_buffer_weights=False))

    ref = resblock1_ref(x, w1, b1, w2, b2)
    # Conv matmuls use bf16 operands (f32 accumulation), so tolerances are
    # loosened vs. the pure-f32 reference.
    np.testing.assert_allclose(np.asarray(out), np.asarray(ref),
                               rtol=2e-2, atol=2e-3)

    print("KERNEL_OK")
</pallas_src>

<mosaic_0001>
module attributes {stable_mosaic.version = 11 : i64} {
  func.func @resblock1_kernel(%arg0: i32, %arg1: i32, %arg2: memref<1x4x16xf32, #tpu.memory_space<vmem>>, %arg3: memref<1x4x16xf32, #tpu.memory_space<vmem>>, %arg4: memref<1x4x16xf32, #tpu.memory_space<vmem>>, %arg5: memref<3x3x4x4xbf16, #tpu.memory_space<vmem>>, %arg6: memref<3x4x1xf32, #tpu.memory_space<vmem>>, %arg7: memref<3x3x4x4xbf16, #tpu.memory_space<vmem>>, %arg8: memref<3x4x1xf32, #tpu.memory_space<vmem>>, %arg9: memref<1x4x16xf32, #tpu.memory_space<vmem>>, %arg10: memref<4x176xbf16, #tpu.memory_space<vmem>>) attributes {dimension_semantics = [#tpu.dimension_semantics<parallel>, #tpu.dimension_semantics<parallel>], iteration_bounds = array<i64: 2, 1>, scalar_prefetch = 0 : i64, scratch_operands = 1 : i64, tpu.core_type = #tpu.core_type<tc>, window_params = [{transform_indices = @transform_0, window_bounds = array<i64: 1, 4, 16>}, {transform_indices = @transform_1, window_bounds = array<i64: 1, 4, 16>}, {transform_indices = @transform_2, window_bounds = array<i64: 1, 4, 16>}, {pipeline_mode = #tpu.pipeline_mode<synchronous>, transform_indices = @transform_3, window_bounds = array<i64: 3, 3, 4, 4>}, {pipeline_mode = #tpu.pipeline_mode<synchronous>, transform_indices = @transform_4, window_bounds = array<i64: 3, 4, 1>}, {pipeline_mode = #tpu.pipeline_mode<synchronous>, transform_indices = @transform_5, window_bounds = array<i64: 3, 3, 4, 4>}, {pipeline_mode = #tpu.pipeline_mode<synchronous>, transform_indices = @transform_6, window_bounds = array<i64: 3, 4, 1>}, {transform_indices = @transform_7, window_bounds = array<i64: 1, 4, 16>}]} {
    %cst = arith.constant 0.000000e+00 : bf16
    %0 = vector.broadcast %cst : bf16 to vector<4x5xbf16>
    %c0 = arith.constant 0 : index
    %c123 = arith.constant 123 : index
    %1 = vector.load %arg10[%c0, %c123] : memref<4x176xbf16, #tpu.memory_space<vmem>>, vector<4x5xbf16>
    tpu.vector_store %arg10[%c0, %c123], %0 {strides = array<i32>} : memref<4x176xbf16, #tpu.memory_space<vmem>>, vector<4x5xbf16>,
    %cst_0 = arith.constant 0.000000e+00 : bf16
    %2 = vector.broadcast %cst_0 : bf16 to vector<4x5xbf16>
    %c0_1 = arith.constant 0 : index
    %c168 = arith.constant 168 : index
    %3 = vector.load %arg10[%c0_1, %c168] : memref<4x176xbf16, #tpu.memory_space<vmem>>, vector<4x5xbf16>
    tpu.vector_store %arg10[%c0_1, %c168], %2 {strides = array<i32>} : memref<4x176xbf16, #tpu.memory_space<vmem>>, vector<4x5xbf16>,
    %c0_2 = arith.constant 0 : index
    %c0_3 = arith.constant 0 : index
    %c4 = arith.constant 4 : index
    %4 = vector.load %arg3[%c0_2, %c0_3, %c4] : memref<1x4x16xf32, #tpu.memory_space<vmem>>, vector<1x4x12xf32>
    %5 = vector.shape_cast %4 : vector<1x4x12xf32> to vector<4x12xf32>
    %c0_4 = arith.constant 0 : index
    %c0_5 = arith.constant 0 : index
    %c0_6 = arith.constant 0 : index
    %6 = vector.load %arg2[%c0_4, %c0_5, %c0_6] : memref<1x4x16xf32, #tpu.memory_space<vmem>>, vector<1x4x16xf32>
    %7 = vector.shape_cast %6 : vector<1x4x16xf32> to vector<4x16xf32>
    %c0_7 = arith.constant 0 : index
    %c0_8 = arith.constant 0 : index
    %c0_9 = arith.constant 0 : index
    %8 = vector.load %arg4[%c0_7, %c0_8, %c0_9] : memref<1x4x16xf32, #tpu.memory_space<vmem>>, vector<1x4x12xf32>
    %9 = vector.shape_cast %8 : vector<1x4x12xf32> to vector<4x12xf32>
    %10 = tpu.concatenate %5, %7, %9 in 1 : vector<4x12xf32>, vector<4x16xf32>, vector<4x12xf32> -> vector<4x40xf32>
    %11 = tpu.iota {dimensions = array<i32: 1>} : vector<1x40xi32>
    %c16_i32 = arith.constant 16 : i32
    %12 = arith.muli %arg1, %c16_i32 : i32
    %c12_i32 = arith.constant 12 : i32
    %13 = arith.subi %12, %c12_i32 : i32
    %14 = vector.broadcast %13 : i32 to vector<1x40xi32>
    %15 = arith.addi %11, %14 : vector<1x40xi32>
    %c0_i32 = arith.constant 0 : i32
    %16 = vector.broadcast %c0_i32 : i32 to vector<1x40xi32>
    %17 = arith.cmpi sge, %15, %16 : vector<1x40xi32>
    %c16_i32_10 = arith.constant 16 : i32
    %18 = vector.broadcast %c16_i32_10 : i32 to vector<1x40xi32>
    %19 = arith.cmpi slt, %15, %18 : vector<1x40xi32>
    %20 = arith.andi %17, %19 : vector<1x40xi1>
    %cst_11 = arith.constant 0.000000e+00 : f32
    %21 = vector.broadcast %cst_11 : f32 to vector<4x40xf32>
    %22 = arith.cmpf oge, %10, %21 : vector<4x40xf32>
    %cst_12 = arith.constant 1.000000e-01 : f32
    %23 = vector.broadcast %cst_12 : f32 to vector<4x40xf32>
    %24 = arith.mulf %10, %23 : vector<4x40xf32>
    %25 = arith.select %22, %10, %24 : vector<4x40xi1>, vector<4x40xf32>
    %cst_13 = arith.constant 0.000000e+00 : f32
    %26 = vector.shape_cast %20 : vector<1x40xi1> to vector<1x40xi1>
    %27 = vector.broadcast %26 : vector<1x40xi1> to vector<4x40xi1>
    %28 = vector.broadcast %cst_13 : f32 to vector<4x40xf32>
    %29 = arith.select %27, %25, %28 : vector<4x40xi1>, vector<4x40xf32>
    %30 = arith.truncf %29 : vector<4x40xf32> to vector<4x40xbf16>
    %c0_14 = arith.constant 0 : index
    %c128 = arith.constant 128 : index
    %31 = vector.load %arg10[%c0_14, %c128] : memref<4x176xbf16, #tpu.memory_space<vmem>>, vector<4x40xbf16>
    tpu.vector_store %arg10[%c0_14, %c128], %30 {strides = array<i32>} : memref<4x176xbf16, #tpu.memory_space<vmem>>, vector<4x40xbf16>,
    %c0_15 = arith.constant 0 : index
    %c0_16 = arith.constant 0 : index
    %c0_17 = arith.constant 0 : index
    %c0_18 = arith.constant 0 : index
    %32 = vector.load %arg5[%c0_15, %c0_16, %c0_17, %c0_18] : memref<3x3x4x4xbf16, #tpu.memory_space<vmem>>, vector<1x1x4x4xbf16>
    %33 = vector.shape_cast %32 : vector<1x1x4x4xbf16> to vector<4x4xbf16>
    %c0_19 = arith.constant 0 : index
    %c127 = arith.constant 127 : index
    %34 = vector.load %arg10[%c0_19, %c127] : memref<4x176xbf16, #tpu.memory_space<vmem>>, vector<4x40xbf16>
    %cst_20 = arith.constant dense<0.000000e+00> : vector<4x40xf32>
    %35 = tpu.matmul %33, %34, %cst_20 {dimension_numbers = #tpu.dot_dimension_numbers<[1], [0], [0], [1], [0, 0, 1, 1], [], []>} : vector<4x4xbf16>, vector<4x40xbf16>, vector<4x40xf32> -> vector<4x40xf32>
    %c0_21 = arith.constant 0 : index
    %c1 = arith.constant 1 : index
    %c0_22 = arith.constant 0 : index
    %c0_23 = arith.constant 0 : index
    %36 = vector.load %arg5[%c0_21, %c1, %c0_22, %c0_23] : memref<3x3x4x4xbf16, #tpu.memory_space<vmem>>, vector<1x1x4x4xbf16>
    %37 = vector.shape_cast %36 : vector<1x1x4x4xbf16> to vector<4x4xbf16>
    %c0_24 = arith.constant 0 : index
    %c128_25 = arith.constant 128 : index
    %38 = vector.load %arg10[%c0_24, %c128_25] : memref<4x176xbf16, #tpu.memory_space<vmem>>, vector<4x40xbf16>
    %cst_26 = arith.constant dense<0.000000e+00> : vector<4x40xf32>
    %39 = tpu.matmul %37, %38, %cst_26 {dimension_numbers = #tpu.dot_dimension_numbers<[1], [0], [0], [1], [0, 0, 1, 1], [], []>} : vector<4x4xbf16>, vector<4x40xbf16>, vector<4x40xf32> -> vector<4x40xf32>
    %40 = arith.addf %35, %39 : vector<4x40xf32>
    %c0_27 = arith.constant 0 : index
    %c2 = arith.constant 2 : index
    %c0_28 = arith.constant 0 : index
    %c0_29 = arith.constant 0 : index
    %41 = vector.load %arg5[%c0_27, %c2, %c0_28, %c0_29] : memref<3x3x4x4xbf16, #tpu.memory_space<vmem>>, vector<1x1x4x4xbf16>
    %42 = vector.shape_cast %41 : vector<1x1x4x4xbf16> to vector<4x4xbf16>
    %c0_30 = arith.constant 0 : index
    %c129 = arith.constant 129 : index
    %43 = vector.load %arg10[%c0_30, %c129] : memref<4x176xbf16, #tpu.memory_space<vmem>>, vector<4x40xbf16>
    %cst_31 = arith.constant dense<0.000000e+00> : vector<4x40xf32>
    %44 = tpu.matmul %42, %43, %cst_31 {dimension_numbers = #tpu.dot_dimension_numbers<[1], [0], [0], [1], [0, 0, 1, 1], [], []>} : vector<4x4xbf16>, vector<4x40xbf16>, vector<4x40xf32> -> vector<4x40xf32>
    %45 = arith.addf %40, %44 : vector<4x40xf32>
    %c0_32 = arith.constant 0 : index
    %c0_33 = arith.constant 0 : index
    %c0_34 = arith.constant 0 : index
    %46 = vector.load %arg6[%c0_32, %c0_33, %c0_34] : memref<3x4x1xf32, #tpu.memory_space<vmem>>, vector<1x4x1xf32>
    %47 = vector.shape_cast %46 : vector<1x4x1xf32> to vector<4x1xf32>
    %48 = vector.broadcast %47 : vector<4x1xf32> to vector<4x40xf32>
    %49 = arith.addf %45, %48 : vector<4x40xf32>
    %cst_35 = arith.constant 0.000000e+00 : f32
    %50 = vector.broadcast %cst_35 : f32 to vector<4x40xf32>
    %51 = arith.cmpf oge, %49, %50 : vector<4x40xf32>
    %cst_36 = arith.constant 1.000000e-01 : f32
    %52 = vector.broadcast %cst_36 : f32 to vector<4x40xf32>
    %53 = arith.mulf %49, %52 : vector<4x40xf32>
    %54 = arith.select %51, %49, %53 : vector<4x40xi1>, vector<4x40xf32>
    %cst_37 = arith.constant 0.000000e+00 : f32
    %55 = vector.shape_cast %20 : vector<1x40xi1> to vector<1x40xi1>
    %56 = vector.broadcast %55 : vector<1x40xi1> to vector<4x40xi1>
    %57 = vector.broadcast %cst_37 : f32 to vector<4x40xf32>
    %58 = arith.select %56, %54, %57 : vector<4x40xi1>, vector<4x40xf32>
    %59 = arith.truncf %58 : vector<4x40xf32> to vector<4x40xbf16>
    %c0_38 = arith.constant 0 : index
    %c128_39 = arith.constant 128 : index
    %60 = vector.load %arg10[%c0_38, %c128_39] : memref<4x176xbf16, #tpu.memory_space<vmem>>, vector<4x40xbf16>
    tpu.vector_store %arg10[%c0_38, %c128_39], %59 {strides = array<i32>} : memref<4x176xbf16, #tpu.memory_space<vmem>>, vector<4x40xbf16>,
    %c0_40 = arith.constant 0 : index
    %c0_41 = arith.constant 0 : index
    %c0_42 = arith.constant 0 : index
    %c0_43 = arith.constant 0 : index
    %61 = vector.load %arg7[%c0_40, %c0_41, %c0_42, %c0_43] : memref<3x3x4x4xbf16, #tpu.memory_space<vmem>>, vector<1x1x4x4xbf16>
    %62 = vector.shape_cast %61 : vector<1x1x4x4xbf16> to vector<4x4xbf16>
    %c0_44 = arith.constant 0 : index
    %c127_45 = arith.constant 127 : index
    %63 = vector.load %arg10[%c0_44, %c127_45] : memref<4x176xbf16, #tpu.memory_space<vmem>>, vector<4x40xbf16>
    %cst_46 = arith.constant dense<0.000000e+00> : vector<4x40xf32>
    %64 = tpu.matmul %62, %63, %cst_46 {dimension_numbers = #tpu.dot_dimension_numbers<[1], [0], [0], [1], [0, 0, 1, 1], [], []>} : vector<4x4xbf16>, vector<4x40xbf16>, vector<4x40xf32> -> vector<4x40xf32>
    %c0_47 = arith.constant 0 : index
    %c1_48 = arith.constant 1 : index
    %c0_49 = arith.constant 0 : index
    %c0_50 = arith.constant 0 : index
    %65 = vector.load %arg7[%c0_47, %c1_48, %c0_49, %c0_50] : memref<3x3x4x4xbf16, #tpu.memory_space<vmem>>, vector<1x1x4x4xbf16>
    %66 = vector.shape_cast %65 : vector<1x1x4x4xbf16> to vector<4x4xbf16>
    %c0_51 = arith.constant 0 : index
    %c128_52 = arith.constant 128 : index
    %67 = vector.load %arg10[%c0_51, %c128_52] : memref<4x176xbf16, #tpu.memory_space<vmem>>, vector<4x40xbf16>
    %cst_53 = arith.constant dense<0.000000e+00> : vector<4x40xf32>
    %68 = tpu.matmul %66, %67, %cst_53 {dimension_numbers = #tpu.dot_dimension_numbers<[1], [0], [0], [1], [0, 0, 1, 1], [], []>} : vector<4x4xbf16>, vector<4x40xbf16>, vector<4x40xf32> -> vector<4x40xf32>
    %69 = arith.addf %64, %68 : vector<4x40xf32>
    %c0_54 = arith.constant 0 : index
    %c2_55 = arith.constant 2 : index
    %c0_56 = arith.constant 0 : index
    %c0_57 = arith.constant 0 : index
    %70 = vector.load %arg7[%c0_54, %c2_55, %c0_56, %c0_57] : memref<3x3x4x4xbf16, #tpu.memory_space<vmem>>, vector<1x1x4x4xbf16>
    %71 = vector.shape_cast %70 : vector<1x1x4x4xbf16> to vector<4x4xbf16>
    %c0_58 = arith.constant 0 : index
    %c129_59 = arith.constant 129 : index
    %72 = vector.load %arg10[%c0_58, %c129_59] : memref<4x176xbf16, #tpu.memory_space<vmem>>, vector<4x40xbf16>
    %cst_60 = arith.constant dense<0.000000e+00> : vector<4x40xf32>
    %73 = tpu.matmul %71, %72, %cst_60 {dimension_numbers = #tpu.dot_dimension_numbers<[1], [0], [0], [1], [0, 0, 1, 1], [], []>} : vector<4x4xbf16>, vector<4x40xbf16>, vector<4x40xf32> -> vector<4x40xf32>
    %74 = arith.addf %69, %73 : vector<4x40xf32>
    %c0_61 = arith.constant 0 : index
    %c0_62 = arith.constant 0 : index
    %c0_63 = arith.constant 0 : index
    %75 = vector.load %arg8[%c0_61, %c0_62, %c0_63] : memref<3x4x1xf32, #tpu.memory_space<vmem>>, vector<1x4x1xf32>
    %76 = vector.shape_cast %75 : vector<1x4x1xf32> to vector<4x1xf32>
    %77 = vector.broadcast %76 : vector<4x1xf32> to vector<4x40xf32>
    %78 = arith.addf %74, %77 : vector<4x40xf32>
    %79 = arith.addf %78, %10 : vector<4x40xf32>
    %cst_64 = arith.constant 0.000000e+00 : f32
    %80 = vector.broadcast %cst_64 : f32 to vector<4x40xf32>
    %81 = arith.cmpf oge, %79, %80 : vector<4x40xf32>
    %cst_65 = arith.constant 1.000000e-01 : f32
    %82 = vector.broadcast %cst_65 : f32 to vector<4x40xf32>
    %83 = arith.mulf %79, %82 : vector<4x40xf32>
    %84 = arith.select %81, %79, %83 : vector<4x40xi1>, vector<4x40xf32>
    %cst_66 = arith.constant 0.000000e+00 : f32
    %85 = vector.shape_cast %20 : vector<1x40xi1> to vector<1x40xi1>
    %86 = vector.broadcast %85 : vector<1x40xi1> to vector<4x40xi1>
    %87 = vector.broadcast %cst_66 : f32 to vector<4x40xf32>
    %88 = arith.select %86, %84, %87 : vector<4x40xi1>, vector<4x40xf32>
    %89 = arith.truncf %88 : vector<4x40xf32> to vector<4x40xbf16>
    %c0_67 = arith.constant 0 : index
    %c128_68 = arith.constant 128 : index
    %90 = vector.load %arg10[%c0_67, %c128_68] : memref<4x176xbf16, #tpu.memory_space<vmem>>, vector<4x40xbf16>
    tpu.vector_store %arg10[%c0_67, %c128_68], %89 {strides = array<i32>} : memref<4x176xbf16, #tpu.memory_space<vmem>>, vector<4x40xbf16>,
    %c1_69 = arith.constant 1 : index
    %c0_70 = arith.constant 0 : index
    %c0_71 = arith.constant 0 : index
    %c0_72 = arith.constant 0 : index
    %91 = vector.load %arg5[%c1_69, %c0_70, %c0_71, %c0_72] : memref<3x3x4x4xbf16, #tpu.memory_space<vmem>>, vector<1x1x4x4xbf16>
    %92 = vector.shape_cast %91 : vector<1x1x4x4xbf16> to vector<4x4xbf16>
    %c0_73 = arith.constant 0 : index
    %c125 = arith.constant 125 : index
    %93 = vector.load %arg10[%c0_73, %c125] : memref<4x176xbf16, #tpu.memory_space<vmem>>, vector<4x40xbf16>
    %cst_74 = arith.constant dense<0.000000e+00> : vector<4x40xf32>
    %94 = tpu.matmul %92, %93, %cst_74 {dimension_numbers = #tpu.dot_dimension_numbers<[1], [0], [0], [1], [0, 0, 1, 1], [], []>} : vector<4x4xbf16>, vector<4x40xbf16>, vector<4x40xf32> -> vector<4x40xf32>
    %c1_75 = arith.constant 1 : index
    %c1_76 = arith.constant 1 : index
    %c0_77 = arith.constant 0 : index
    %c0_78 = arith.constant 0 : index
    %95 = vector.load %arg5[%c1_75, %c1_76, %c0_77, %c0_78] : memref<3x3x4x4xbf16, #tpu.memory_space<vmem>>, vector<1x1x4x4xbf16>
    %96 = vector.shape_cast %95 : vector<1x1x4x4xbf16> to vector<4x4xbf16>
    %c0_79 = arith.constant 0 : index
    %c128_80 = arith.constant 128 : index
    %97 = vector.load %arg10[%c0_79, %c128_80] : memref<4x176xbf16, #tpu.memory_space<vmem>>, vector<4x40xbf16>
    %cst_81 = arith.constant dense<0.000000e+00> : vector<4x40xf32>
    %98 = tpu.matmul %96, %97, %cst_81 {dimension_numbers = #tpu.dot_dimension_numbers<[1], [0], [0], [1], [0, 0, 1, 1], [], []>} : vector<4x4xbf16>, vector<4x40xbf16>, vector<4x40xf32> -> vector<4x40xf32>
    %99 = arith.addf %94, %98 : vector<4x40xf32>
    %c1_82 = arith.constant 1 : index
    %c2_83 = arith.constant 2 : index
    %c0_84 = arith.constant 0 : index
    %c0_85 = arith.constant 0 : index
    %100 = vector.load %arg5[%c1_82, %c2_83, %c0_84, %c0_85] : memref<3x3x4x4xbf16, #tpu.memory_space<vmem>>, vector<1x1x4x4xbf16>
    %101 = vector.shape_cast %100 : vector<1x1x4x4xbf16> to vector<4x4xbf16>
    %c0_86 = arith.constant 0 : index
    %c131 = arith.constant 131 : index
    %102 = vector.load %arg10[%c0_86, %c131] : memref<4x176xbf16, #tpu.memory_space<vmem>>, vector<4x40xbf16>
    %cst_87 = arith.constant dense<0.000000e+00> : vector<4x40xf32>
    %103 = tpu.matmul %101, %102, %cst_87 {dimension_numbers = #tpu.dot_dimension_numbers<[1], [0], [0], [1], [0, 0, 1, 1], [], []>} : vector<4x4xbf16>, vector<4x40xbf16>, vector<4x40xf32> -> vector<4x40xf32>
    %104 = arith.addf %99, %103 : vector<4x40xf32>
    %c1_88 = arith.constant 1 : index
    %c0_89 = arith.constant 0 : index
    %c0_90 = arith.constant 0 : index
    %105 = vector.load %arg6[%c1_88, %c0_89, %c0_90] : memref<3x4x1xf32, #tpu.memory_space<vmem>>, vector<1x4x1xf32>
    %106 = vector.shape_cast %105 : vector<1x4x1xf32> to vector<4x1xf32>
    %107 = vector.broadcast %106 : vector<4x1xf32> to vector<4x40xf32>
    %108 = arith.addf %104, %107 : vector<4x40xf32>
    %cst_91 = arith.constant 0.000000e+00 : f32
    %109 = vector.broadcast %cst_91 : f32 to vector<4x40xf32>
    %110 = arith.cmpf oge, %108, %109 : vector<4x40xf32>
    %cst_92 = arith.constant 1.000000e-01 : f32
    %111 = vector.broadcast %cst_92 : f32 to vector<4x40xf32>
    %112 = arith.mulf %108, %111 : vector<4x40xf32>
    %113 = arith.select %110, %108, %112 : vector<4x40xi1>, vector<4x40xf32>
    %cst_93 = arith.constant 0.000000e+00 : f32
    %114 = vector.shape_cast %20 : vector<1x40xi1> to vector<1x40xi1>
    %115 = vector.broadcast %114 : vector<1x40xi1> to vector<4x40xi1>
    %116 = vector.broadcast %cst_93 : f32 to vector<4x40xf32>
    %117 = arith.select %115, %113, %116 : vector<4x40xi1>, vector<4x40xf32>
    %118 = arith.truncf %117 : vector<4x40xf32> to vector<4x40xbf16>
    %c0_94 = arith.constant 0 : index
    %c128_95 = arith.constant 128 : index
    %119 = vector.load %arg10[%c0_94, %c128_95] : memref<4x176xbf16, #tpu.memory_space<vmem>>, vector<4x40xbf16>
    tpu.vector_store %arg10[%c0_94, %c128_95], %118 {strides = array<i32>} : memref<4x176xbf16, #tpu.memory_space<vmem>>, vector<4x40xbf16>,
    %c1_96 = arith.constant 1 : index
    %c0_97 = arith.constant 0 : index
    %c0_98 = arith.constant 0 : index
    %c0_99 = arith.constant 0 : index
    %120 = vector.load %arg7[%c1_96, %c0_97, %c0_98, %c0_99] : memref<3x3x4x4xbf16, #tpu.memory_space<vmem>>, vector<1x1x4x4xbf16>
    %121 = vector.shape_cast %120 : vector<1x1x4x4xbf16> to vector<4x4xbf16>
    %c0_100 = arith.constant 0 : index
    %c127_101 = arith.constant 127 : index
    %122 = vector.load %arg10[%c0_100, %c127_101] : memref<4x176xbf16, #tpu.memory_space<vmem>>, vector<4x40xbf16>
    %cst_102 = arith.constant dense<0.000000e+00> : vector<4x40xf32>
    %123 = tpu.matmul %121, %122, %cst_102 {dimension_numbers = #tpu.dot_dimension_numbers<[1], [0], [0], [1], [0, 0, 1, 1], [], []>} : vector<4x4xbf16>, vector<4x40xbf16>, vector<4x40xf32> -> vector<4x40xf32>
    %c1_103 = arith.constant 1 : index
    %c1_104 = arith.constant 1 : index
    %c0_105 = arith.constant 0 : index
    %c0_106 = arith.constant 0 : index
    %124 = vector.load %arg7[%c1_103, %c1_104, %c0_105, %c0_106] : memref<3x3x4x4xbf16, #tpu.memory_space<vmem>>, vector<1x1x4x4xbf16>
    %125 = vector.shape_cast %124 : vector<1x1x4x4xbf16> to vector<4x4xbf16>
    %c0_107 = arith.constant 0 : index
    %c128_108 = arith.constant 128 : index
    %126 = vector.load %arg10[%c0_107, %c128_108] : memref<4x176xbf16, #tpu.memory_space<vmem>>, vector<4x40xbf16>
    %cst_109 = arith.constant dense<0.000000e+00> : vector<4x40xf32>
    %127 = tpu.matmul %125, %126, %cst_109 {dimension_numbers = #tpu.dot_dimension_numbers<[1], [0], [0], [1], [0, 0, 1, 1], [], []>} : vector<4x4xbf16>, vector<4x40xbf16>, vector<4x40xf32> -> vector<4x40xf32>
    %128 = arith.addf %123, %127 : vector<4x40xf32>
    %c1_110 = arith.constant 1 : index
    %c2_111 = arith.constant 2 : index
    %c0_112 = arith.constant 0 : index
    %c0_113 = arith.constant 0 : index
    %129 = vector.load %arg7[%c1_110, %c2_111, %c0_112, %c0_113] : memref<3x3x4x4xbf16, #tpu.memory_space<vmem>>, vector<1x1x4x4xbf16>
    %130 = vector.shape_cast %129 : vector<1x1x4x4xbf16> to vector<4x4xbf16>
    %c0_114 = arith.constant 0 : index
    %c129_115 = arith.constant 129 : index
    %131 = vector.load %arg10[%c0_114, %c129_115] : memref<4x176xbf16, #tpu.memory_space<vmem>>, vector<4x40xbf16>
    %cst_116 = arith.constant dense<0.000000e+00> : vector<4x40xf32>
    %132 = tpu.matmul %130, %131, %cst_116 {dimension_numbers = #tpu.dot_dimension_numbers<[1], [0], [0], [1], [0, 0, 1, 1], [], []>} : vector<4x4xbf16>, vector<4x40xbf16>, vector<4x40xf32> -> vector<4x40xf32>
    %133 = arith.addf %128, %132 : vector<4x40xf32>
    %c1_117 = arith.constant 1 : index
    %c0_118 = arith.constant 0 : index
    %c0_119 = arith.constant 0 : index
    %134 = vector.load %arg8[%c1_117, %c0_118, %c0_119] : memref<3x4x1xf32, #tpu.memory_space<vmem>>, vector<1x4x1xf32>
    %135 = vector.shape_cast %134 : vector<1x4x1xf32> to vector<4x1xf32>
    %136 = vector.broadcast %135 : vector<4x1xf32> to vector<4x40xf32>
    %137 = arith.addf %133, %136 : vector<4x40xf32>
    %138 = arith.addf %137, %79 : vector<4x40xf32>
    %cst_120 = arith.constant 0.000000e+00 : f32
    %139 = vector.broadcast %cst_120 : f32 to vector<4x40xf32>
    %140 = arith.cmpf oge, %138, %139 : vector<4x40xf32>
    %cst_121 = arith.constant 1.000000e-01 : f32
    %141 = vector.broadcast %cst_121 : f32 to vector<4x40xf32>
    %142 = arith.mulf %138, %141 : vector<4x40xf32>
    %143 = arith.select %140, %138, %142 : vector<4x40xi1>, vector<4x40xf32>
    %cst_122 = arith.constant 0.000000e+00 : f32
    %144 = vector.shape_cast %20 : vector<1x40xi1> to vector<1x40xi1>
    %145 = vector.broadcast %144 : vector<1x40xi1> to vector<4x40xi1>
    %146 = vector.broadcast %cst_122 : f32 to vector<4x40xf32>
    %147 = arith.select %145, %143, %146 : vector<4x40xi1>, vector<4x40xf32>
    %148 = arith.truncf %147 : vector<4x40xf32> to vector<4x40xbf16>
    %c0_123 = arith.constant 0 : index
    %c128_124 = arith.constant 128 : index
    %149 = vector.load %arg10[%c0_123, %c128_124] : memref<4x176xbf16, #tpu.memory_space<vmem>>, vector<4x40xbf16>
    tpu.vector_store %arg10[%c0_123, %c128_124], %148 {strides = array<i32>} : memref<4x176xbf16, #tpu.memory_space<vmem>>, vector<4x40xbf16>,
    %c2_125 = arith.constant 2 : index
    %c0_126 = arith.constant 0 : index
    %c0_127 = arith.constant 0 : index
    %c0_128 = arith.constant 0 : index
    %150 = vector.load %arg5[%c2_125, %c0_126, %c0_127, %c0_128] : memref<3x3x4x4xbf16, #tpu.memory_space<vmem>>, vector<1x1x4x4xbf16>
    %151 = vector.shape_cast %150 : vector<1x1x4x4xbf16> to vector<4x4xbf16>
    %c0_129 = arith.constant 0 : index
    %c123_130 = arith.constant 123 : index
    %152 = vector.load %arg10[%c0_129, %c123_130] : memref<4x176xbf16, #tpu.memory_space<vmem>>, vector<4x40xbf16>
    %cst_131 = arith.constant dense<0.000000e+00> : vector<4x40xf32>
    %153 = tpu.matmul %151, %152, %cst_131 {dimension_numbers = #tpu.dot_dimension_numbers<[1], [0], [0], [1], [0, 0, 1, 1], [], []>} : vector<4x4xbf16>, vector<4x40xbf16>, vector<4x40xf32> -> vector<4x40xf32>
    %c2_132 = arith.constant 2 : index
    %c1_133 = arith.constant 1 : index
    %c0_134 = arith.constant 0 : index
    %c0_135 = arith.constant 0 : index
    %154 = vector.load %arg5[%c2_132, %c1_133, %c0_134, %c0_135] : memref<3x3x4x4xbf16, #tpu.memory_space<vmem>>, vector<1x1x4x4xbf16>
    %155 = vector.shape_cast %154 : vector<1x1x4x4xbf16> to vector<4x4xbf16>
    %c0_136 = arith.constant 0 : index
    %c128_137 = arith.constant 128 : index
    %156 = vector.load %arg10[%c0_136, %c128_137] : memref<4x176xbf16, #tpu.memory_space<vmem>>, vector<4x40xbf16>
    %cst_138 = arith.constant dense<0.000000e+00> : vector<4x40xf32>
    %157 = tpu.matmul %155, %156, %cst_138 {dimension_numbers = #tpu.dot_dimension_numbers<[1], [0], [0], [1], [0, 0, 1, 1], [], []>} : vector<4x4xbf16>, vector<4x40xbf16>, vector<4x40xf32> -> vector<4x40xf32>
    %158 = arith.addf %153, %157 : vector<4x40xf32>
    %c2_139 = arith.constant 2 : index
    %c2_140 = arith.constant 2 : index
    %c0_141 = arith.constant 0 : index
    %c0_142 = arith.constant 0 : index
    %159 = vector.load %arg5[%c2_139, %c2_140, %c0_141, %c0_142] : memref<3x3x4x4xbf16, #tpu.memory_space<vmem>>, vector<1x1x4x4xbf16>
    %160 = vector.shape_cast %159 : vector<1x1x4x4xbf16> to vector<4x4xbf16>
    %c0_143 = arith.constant 0 : index
    %c133 = arith.constant 133 : index
    %161 = vector.load %arg10[%c0_143, %c133] : memref<4x176xbf16, #tpu.memory_space<vmem>>, vector<4x40xbf16>
    %cst_144 = arith.constant dense<0.000000e+00> : vector<4x40xf32>
    %162 = tpu.matmul %160, %161, %cst_144 {dimension_numbers = #tpu.dot_dimension_numbers<[1], [0], [0], [1], [0, 0, 1, 1], [], []>} : vector<4x4xbf16>, vector<4x40xbf16>, vector<4x40xf32> -> vector<4x40xf32>
    %163 = arith.addf %158, %162 : vector<4x40xf32>
    %c2_145 = arith.constant 2 : index
    %c0_146 = arith.constant 0 : index
    %c0_147 = arith.constant 0 : index
    %164 = vector.load %arg6[%c2_145, %c0_146, %c0_147] : memref<3x4x1xf32, #tpu.memory_space<vmem>>, vector<1x4x1xf32>
    %165 = vector.shape_cast %164 : vector<1x4x1xf32> to vector<4x1xf32>
    %166 = vector.broadcast %165 : vector<4x1xf32> to vector<4x40xf32>
    %167 = arith.addf %163, %166 : vector<4x40xf32>
    %cst_148 = arith.constant 0.000000e+00 : f32
    %168 = vector.broadcast %cst_148 : f32 to vector<4x40xf32>
    %169 = arith.cmpf oge, %167, %168 : vector<4x40xf32>
    %cst_149 = arith.constant 1.000000e-01 : f32
    %170 = vector.broadcast %cst_149 : f32 to vector<4x40xf32>
    %171 = arith.mulf %167, %170 : vector<4x40xf32>
    %172 = arith.select %169, %167, %171 : vector<4x40xi1>, vector<4x40xf32>
    %cst_150 = arith.constant 0.000000e+00 : f32
    %173 = vector.shape_cast %20 : vector<1x40xi1> to vector<1x40xi1>
    %174 = vector.broadcast %173 : vector<1x40xi1> to vector<4x40xi1>
    %175 = vector.broadcast %cst_150 : f32 to vector<4x40xf32>
    %176 = arith.select %174, %172, %175 : vector<4x40xi1>, vector<4x40xf32>
    %177 = arith.truncf %176 : vector<4x40xf32> to vector<4x40xbf16>
    %c0_151 = arith.constant 0 : index
    %c128_152 = arith.constant 128 : index
    %178 = vector.load %arg10[%c0_151, %c128_152] : memref<4x176xbf16, #tpu.memory_space<vmem>>, vector<4x40xbf16>
    tpu.vector_store %arg10[%c0_151, %c128_152], %177 {strides = array<i32>} : memref<4x176xbf16, #tpu.memory_space<vmem>>, vector<4x40xbf16>,
    %c2_153 = arith.constant 2 : index
    %c0_154 = arith.constant 0 : index
    %c0_155 = arith.constant 0 : index
    %c0_156 = arith.constant 0 : index
    %179 = vector.load %arg7[%c2_153, %c0_154, %c0_155, %c0_156] : memref<3x3x4x4xbf16, #tpu.memory_space<vmem>>, vector<1x1x4x4xbf16>
    %180 = vector.shape_cast %179 : vector<1x1x4x4xbf16> to vector<4x4xbf16>
    %c0_157 = arith.constant 0 : index
    %c127_158 = arith.constant 127 : index
    %181 = vector.load %arg10[%c0_157, %c127_158] : memref<4x176xbf16, #tpu.memory_space<vmem>>, vector<4x40xbf16>
    %cst_159 = arith.constant dense<0.000000e+00> : vector<4x40xf32>
    %182 = tpu.matmul %180, %181, %cst_159 {dimension_numbers = #tpu.dot_dimension_numbers<[1], [0], [0], [1], [0, 0, 1, 1], [], []>} : vector<4x4xbf16>, vector<4x40xbf16>, vector<4x40xf32> -> vector<4x40xf32>
    %c2_160 = arith.constant 2 : index
    %c1_161 = arith.constant 1 : index
    %c0_162 = arith.constant 0 : index
    %c0_163 = arith.constant 0 : index
    %183 = vector.load %arg7[%c2_160, %c1_161, %c0_162, %c0_163] : memref<3x3x4x4xbf16, #tpu.memory_space<vmem>>, vector<1x1x4x4xbf16>
    %184 = vector.shape_cast %183 : vector<1x1x4x4xbf16> to vector<4x4xbf16>
    %c0_164 = arith.constant 0 : index
    %c128_165 = arith.constant 128 : index
    %185 = vector.load %arg10[%c0_164, %c128_165] : memref<4x176xbf16, #tpu.memory_space<vmem>>, vector<4x40xbf16>
    %cst_166 = arith.constant dense<0.000000e+00> : vector<4x40xf32>
    %186 = tpu.matmul %184, %185, %cst_166 {dimension_numbers = #tpu.dot_dimension_numbers<[1], [0], [0], [1], [0, 0, 1, 1], [], []>} : vector<4x4xbf16>, vector<4x40xbf16>, vector<4x40xf32> -> vector<4x40xf32>
    %187 = arith.addf %182, %186 : vector<4x40xf32>
    %c2_167 = arith.constant 2 : index
    %c2_168 = arith.constant 2 : index
    %c0_169 = arith.constant 0 : index
    %c0_170 = arith.constant 0 : index
    %188 = vector.load %arg7[%c2_167, %c2_168, %c0_169, %c0_170] : memref<3x3x4x4xbf16, #tpu.memory_space<vmem>>, vector<1x1x4x4xbf16>
    %189 = vector.shape_cast %188 : vector<1x1x4x4xbf16> to vector<4x4xbf16>
    %c0_171 = arith.constant 0 : index
    %c129_172 = arith.constant 129 : index
    %190 = vector.load %arg10[%c0_171, %c129_172] : memref<4x176xbf16, #tpu.memory_space<vmem>>, vector<4x40xbf16>
    %cst_173 = arith.constant dense<0.000000e+00> : vector<4x40xf32>
    %191 = tpu.matmul %189, %190, %cst_173 {dimension_numbers = #tpu.dot_dimension_numbers<[1], [0], [0], [1], [0, 0, 1, 1], [], []>} : vector<4x4xbf16>, vector<4x40xbf16>, vector<4x40xf32> -> vector<4x40xf32>
    %192 = arith.addf %187, %191 : vector<4x40xf32>
    %c2_174 = arith.constant 2 : index
    %c0_175 = arith.constant 0 : index
    %c0_176 = arith.constant 0 : index
    %193 = vector.load %arg8[%c2_174, %c0_175, %c0_176] : memref<3x4x1xf32, #tpu.memory_space<vmem>>, vector<1x4x1xf32>
    %194 = vector.shape_cast %193 : vector<1x4x1xf32> to vector<4x1xf32>
    %195 = vector.broadcast %194 : vector<4x1xf32> to vector<4x40xf32>
    %196 = arith.addf %192, %195 : vector<4x40xf32>
    %197 = arith.addf %196, %138 : vector<4x40xf32>
    %198 = vector.extract_strided_slice %197 {offsets = [0, 12], sizes = [4, 16], strides = [1, 1]} : vector<4x40xf32> to vector<4x16xf32>
    %c0_177 = arith.constant 0 : index
    %c0_178 = arith.constant 0 : index
    %c0_179 = arith.constant 0 : index
    %199 = vector.load %arg9[%c0_177, %c0_178, %c0_179] : memref<1x4x16xf32, #tpu.memory_space<vmem>>, vector<1x4x16xf32>
    %200 = vector.shape_cast %199 : vector<1x4x16xf32> to vector<4x16xf32>
    %201 = vector.shape_cast %198 : vector<4x16xf32> to vector<1x4x16xf32>
    tpu.vector_store %arg9[%c0_177, %c0_178, %c0_179], %201 {strides = array<i32>} : memref<1x4x16xf32, #tpu.memory_space<vmem>>, vector<1x4x16xf32>,
    return
  }
  func.func @transform_0(%arg0: i32, %arg1: i32) -> (i32, i32, i32) {
    %c0_i32 = arith.constant 0 : i32
    %c0_i32_0 = arith.constant 0 : i32
    return %arg0, %c0_i32, %arg1 : i32, i32, i32
  }
  func.func @transform_1(%arg0: i32, %arg1: i32) -> (i32, i32, i32) {
    %c1_i32 = arith.constant 1 : i32
    %0 = arith.muli %arg1, %c1_i32 : i32
    %c1_i32_0 = arith.constant 1 : i32
    %1 = arith.subi %0, %c1_i32_0 : i32
    %c0_i32 = arith.constant 0 : i32
    %2 = arith.maxsi %1, %c0_i32 : i32
    %c0_i32_1 = arith.constant 0 : i32
    %c0_i32_2 = arith.constant 0 : i32
    return %arg0, %c0_i32_1, %2 : i32, i32, i32
  }
  func.func @transform_2(%arg0: i32, %arg1: i32) -> (i32, i32, i32) {
    %c1_i32 = arith.constant 1 : i32
    %0 = arith.addi %arg1, %c1_i32 : i32
    %c1_i32_0 = arith.constant 1 : i32
    %1 = arith.muli %0, %c1_i32_0 : i32
    %c0_i32 = arith.constant 0 : i32
    %2 = arith.minsi %1, %c0_i32 : i32
    %c0_i32_1 = arith.constant 0 : i32
    %c0_i32_2 = arith.constant 0 : i32
    return %arg0, %c0_i32_1, %2 : i32, i32, i32
  }
  func.func @transform_3(%arg0: i32, %arg1: i32) -> (i32, i32, i32, i32) {
    %c0_i32 = arith.constant 0 : i32
    %c0_i32_0 = arith.constant 0 : i32
    %c0_i32_1 = arith.constant 0 : i32
    %c0_i32_2 = arith.constant 0 : i32
    %c0_i32_3 = arith.constant 0 : i32
    return %c0_i32, %c0_i32_0, %c0_i32_1, %c0_i32_2 : i32, i32, i32, i32
  }
  func.func @transform_4(%arg0: i32, %arg1: i32) -> (i32, i32, i32) {
    %c0_i32 = arith.constant 0 : i32
    %c0_i32_0 = arith.constant 0 : i32
    %c0_i32_1 = arith.constant 0 : i32
    %c0_i32_2 = arith.constant 0 : i32
    return %c0_i32, %c0_i32_0, %c0_i32_1 : i32, i32, i32
  }
  func.func @transform_5(%arg0: i32, %arg1: i32) -> (i32, i32, i32, i32) {
    %c0_i32 = arith.constant 0 : i32
    %c0_i32_0 = arith.constant 0 : i32
    %c0_i32_1 = arith.constant 0 : i32
    %c0_i32_2 = arith.constant 0 : i32
    %c0_i32_3 = arith.constant 0 : i32
    return %c0_i32, %c0_i32_0, %c0_i32_1, %c0_i32_2 : i32, i32, i32, i32
  }
  func.func @transform_6(%arg0: i32, %arg1: i32) -> (i32, i32, i32) {
    %c0_i32 = arith.constant 0 : i32
    %c0_i32_0 = arith.constant 0 : i32
    %c0_i32_1 = arith.constant 0 : i32
    %c0_i32_2 = arith.constant 0 : i32
    return %c0_i32, %c0_i32_0, %c0_i32_1 : i32, i32, i32
  }
  func.func @transform_7(%arg0: i32, %arg1: i32) -> (i32, i32, i32) {
    %c0_i32 = arith.constant 0 : i32
    %c0_i32_0 = arith.constant 0 : i32
    return %arg0, %c0_i32, %arg1 : i32, i32, i32
  }
}

module attributes {stable_mosaic.version = 11 : i64} {
  func.func @resblock1_kernel(%arg0: i32, %arg1: i32, %arg2: memref<1x4x16xf32, #tpu.memory_space<vmem>>, %arg3: memref<1x4x16xf32, #tpu.memory_space<vmem>>, %arg4: memref<1x4x16xf32, #tpu.memory_space<vmem>>, %arg5: memref<3x3x4x4xbf16, #tpu.memory_space<vmem>>, %arg6: memref<3x4x1xf32, #tpu.memory_space<vmem>>, %arg7: memref<3x3x4x4xbf16, #tpu.memory_space<vmem>>, %arg8: memref<3x4x1xf32, #tpu.memory_space<vmem>>, %arg9: memref<1x4x16xf32, #tpu.memory_space<vmem>>, %arg10: memref<4x176xbf16, #tpu.memory_space<vmem>>) attributes {dimension_semantics = [#tpu.dimension_semantics<parallel>, #tpu.dimension_semantics<parallel>], iteration_bounds = array<i64: 2, 1>, scalar_prefetch = 0 : i64, scratch_operands = 1 : i64, tpu.core_type = #tpu.core_type<tc>, window_params = [{transform_indices = @transform_0, window_bounds = array<i64: 1, 4, 16>}, {transform_indices = @transform_1, window_bounds = array<i64: 1, 4, 16>}, {transform_indices = @transform_2, window_bounds = array<i64: 1, 4, 16>}, {pipeline_mode = #tpu.pipeline_mode<synchronous>, transform_indices = @transform_3, window_bounds = array<i64: 3, 3, 4, 4>}, {pipeline_mode = #tpu.pipeline_mode<synchronous>, transform_indices = @transform_4, window_bounds = array<i64: 3, 4, 1>}, {pipeline_mode = #tpu.pipeline_mode<synchronous>, transform_indices = @transform_5, window_bounds = array<i64: 3, 3, 4, 4>}, {pipeline_mode = #tpu.pipeline_mode<synchronous>, transform_indices = @transform_6, window_bounds = array<i64: 3, 4, 1>}, {transform_indices = @transform_7, window_bounds = array<i64: 1, 4, 16>}]} {
    %cst = arith.constant 0.000000e+00 : bf16
    %0 = vector.broadcast %cst : bf16 to vector<4x5xbf16>
    %c0 = arith.constant 0 : index
    %c123 = arith.constant 123 : index
    %1 = vector.load %arg10[%c0, %c123] : memref<4x176xbf16, #tpu.memory_space<vmem>>, vector<4x5xbf16>
    tpu.vector_store %arg10[%c0, %c123], %0 {strides = array<i32>} : memref<4x176xbf16, #tpu.memory_space<vmem>>, vector<4x5xbf16>,
    %cst_0 = arith.constant 0.000000e+00 : bf16
    %2 = vector.broadcast %cst_0 : bf16 to vector<4x5xbf16>
    %c0_1 = arith.constant 0 : index
    %c168 = arith.constant 168 : index
    %3 = vector.load %arg10[%c0_1, %c168] : memref<4x176xbf16, #tpu.memory_space<vmem>>, vector<4x5xbf16>
    tpu.vector_store %arg10[%c0_1, %c168], %2 {strides = array<i32>} : memref<4x176xbf16, #tpu.memory_space<vmem>>, vector<4x5xbf16>,
    %c0_2 = arith.constant 0 : index
    %c0_3 = arith.constant 0 : index
    %c4 = arith.constant 4 : index
    %4 = vector.load %arg3[%c0_2, %c0_3, %c4] : memref<1x4x16xf32, #tpu.memory_space<vmem>>, vector<1x4x12xf32>
    %5 = vector.shape_cast %4 : vector<1x4x12xf32> to vector<4x12xf32>
    %c0_4 = arith.constant 0 : index
    %c0_5 = arith.constant 0 : index
    %c0_6 = arith.constant 0 : index
    %6 = vector.load %arg2[%c0_4, %c0_5, %c0_6] : memref<1x4x16xf32, #tpu.memory_space<vmem>>, vector<1x4x16xf32>
    %7 = vector.shape_cast %6 : vector<1x4x16xf32> to vector<4x16xf32>
    %c0_7 = arith.constant 0 : index
    %c0_8 = arith.constant 0 : index
    %c0_9 = arith.constant 0 : index
    %8 = vector.load %arg4[%c0_7, %c0_8, %c0_9] : memref<1x4x16xf32, #tpu.memory_space<vmem>>, vector<1x4x12xf32>
    %9 = vector.shape_cast %8 : vector<1x4x12xf32> to vector<4x12xf32>
    %10 = tpu.concatenate %5, %7, %9 in 1 : vector<4x12xf32>, vector<4x16xf32>, vector<4x12xf32> -> vector<4x40xf32>
    %11 = tpu.iota {dimensions = array<i32: 1>} : vector<1x40xi32>
    %c16_i32 = arith.constant 16 : i32
    %12 = arith.muli %arg1, %c16_i32 : i32
    %c12_i32 = arith.constant 12 : i32
    %13 = arith.subi %12, %c12_i32 : i32
    %14 = vector.broadcast %13 : i32 to vector<1x40xi32>
    %15 = arith.addi %11, %14 : vector<1x40xi32>
    %c0_i32 = arith.constant 0 : i32
    %16 = vector.broadcast %c0_i32 : i32 to vector<1x40xi32>
    %17 = arith.cmpi sge, %15, %16 : vector<1x40xi32>
    %c16_i32_10 = arith.constant 16 : i32
    %18 = vector.broadcast %c16_i32_10 : i32 to vector<1x40xi32>
    %19 = arith.cmpi slt, %15, %18 : vector<1x40xi32>
    %20 = arith.andi %17, %19 : vector<1x40xi1>
    %cst_11 = arith.constant 0.000000e+00 : f32
    %21 = vector.broadcast %cst_11 : f32 to vector<4x40xf32>
    %22 = arith.cmpf oge, %10, %21 : vector<4x40xf32>
    %cst_12 = arith.constant 1.000000e-01 : f32
    %23 = vector.broadcast %cst_12 : f32 to vector<4x40xf32>
    %24 = arith.mulf %10, %23 : vector<4x40xf32>
    %25 = arith.select %22, %10, %24 : vector<4x40xi1>, vector<4x40xf32>
    %cst_13 = arith.constant 0.000000e+00 : f32
    %26 = vector.shape_cast %20 : vector<1x40xi1> to vector<1x40xi1>
    %27 = vector.broadcast %26 : vector<1x40xi1> to vector<4x40xi1>
    %28 = vector.broadcast %cst_13 : f32 to vector<4x40xf32>
    %29 = arith.select %27, %25, %28 : vector<4x40xi1>, vector<4x40xf32>
    %30 = arith.truncf %29 : vector<4x40xf32> to vector<4x40xbf16>
    %c0_14 = arith.constant 0 : index
    %c128 = arith.constant 128 : index
    %31 = vector.load %arg10[%c0_14, %c128] : memref<4x176xbf16, #tpu.memory_space<vmem>>, vector<4x40xbf16>
    tpu.vector_store %arg10[%c0_14, %c128], %30 {strides = array<i32>} : memref<4x176xbf16, #tpu.memory_space<vmem>>, vector<4x40xbf16>,
    %c0_15 = arith.constant 0 : index
    %c0_16 = arith.constant 0 : index
    %c0_17 = arith.constant 0 : index
    %c0_18 = arith.constant 0 : index
    %32 = vector.load %arg5[%c0_15, %c0_16, %c0_17, %c0_18] : memref<3x3x4x4xbf16, #tpu.memory_space<vmem>>, vector<1x1x4x4xbf16>
    %33 = vector.shape_cast %32 : vector<1x1x4x4xbf16> to vector<4x4xbf16>
    %c0_19 = arith.constant 0 : index
    %c127 = arith.constant 127 : index
    %34 = vector.load %arg10[%c0_19, %c127] : memref<4x176xbf16, #tpu.memory_space<vmem>>, vector<4x40xbf16>
    %cst_20 = arith.constant dense<0.000000e+00> : vector<4x40xf32>
    %35 = tpu.matmul %33, %34, %cst_20 {dimension_numbers = #tpu.dot_dimension_numbers<[1], [0], [0], [1], [0, 0, 1, 1], [], []>} : vector<4x4xbf16>, vector<4x40xbf16>, vector<4x40xf32> -> vector<4x40xf32>
    %c0_21 = arith.constant 0 : index
    %c1 = arith.constant 1 : index
    %c0_22 = arith.constant 0 : index
    %c0_23 = arith.constant 0 : index
    %36 = vector.load %arg5[%c0_21, %c1, %c0_22, %c0_23] : memref<3x3x4x4xbf16, #tpu.memory_space<vmem>>, vector<1x1x4x4xbf16>
    %37 = vector.shape_cast %36 : vector<1x1x4x4xbf16> to vector<4x4xbf16>
    %c0_24 = arith.constant 0 : index
    %c128_25 = arith.constant 128 : index
    %38 = vector.load %arg10[%c0_24, %c128_25] : memref<4x176xbf16, #tpu.memory_space<vmem>>, vector<4x40xbf16>
    %cst_26 = arith.constant dense<0.000000e+00> : vector<4x40xf32>
    %39 = tpu.matmul %37, %38, %cst_26 {dimension_numbers = #tpu.dot_dimension_numbers<[1], [0], [0], [1], [0, 0, 1, 1], [], []>} : vector<4x4xbf16>, vector<4x40xbf16>, vector<4x40xf32> -> vector<4x40xf32>
    %40 = arith.addf %35, %39 : vector<4x40xf32>
    %c0_27 = arith.constant 0 : index
    %c2 = arith.constant 2 : index
    %c0_28 = arith.constant 0 : index
    %c0_29 = arith.constant 0 : index
    %41 = vector.load %arg5[%c0_27, %c2, %c0_28, %c0_29] : memref<3x3x4x4xbf16, #tpu.memory_space<vmem>>, vector<1x1x4x4xbf16>
    %42 = vector.shape_cast %41 : vector<1x1x4x4xbf16> to vector<4x4xbf16>
    %c0_30 = arith.constant 0 : index
    %c129 = arith.constant 129 : index
    %43 = vector.load %arg10[%c0_30, %c129] : memref<4x176xbf16, #tpu.memory_space<vmem>>, vector<4x40xbf16>
    %cst_31 = arith.constant dense<0.000000e+00> : vector<4x40xf32>
    %44 = tpu.matmul %42, %43, %cst_31 {dimension_numbers = #tpu.dot_dimension_numbers<[1], [0], [0], [1], [0, 0, 1, 1], [], []>} : vector<4x4xbf16>, vector<4x40xbf16>, vector<4x40xf32> -> vector<4x40xf32>
    %45 = arith.addf %40, %44 : vector<4x40xf32>
    %c0_32 = arith.constant 0 : index
    %c0_33 = arith.constant 0 : index
    %c0_34 = arith.constant 0 : index
    %46 = vector.load %arg6[%c0_32, %c0_33, %c0_34] : memref<3x4x1xf32, #tpu.memory_space<vmem>>, vector<1x4x1xf32>
    %47 = vector.shape_cast %46 : vector<1x4x1xf32> to vector<4x1xf32>
    %48 = vector.broadcast %47 : vector<4x1xf32> to vector<4x40xf32>
    %49 = arith.addf %45, %48 : vector<4x40xf32>
    %cst_35 = arith.constant 0.000000e+00 : f32
    %50 = vector.broadcast %cst_35 : f32 to vector<4x40xf32>
    %51 = arith.cmpf oge, %49, %50 : vector<4x40xf32>
    %cst_36 = arith.constant 1.000000e-01 : f32
    %52 = vector.broadcast %cst_36 : f32 to vector<4x40xf32>
    %53 = arith.mulf %49, %52 : vector<4x40xf32>
    %54 = arith.select %51, %49, %53 : vector<4x40xi1>, vector<4x40xf32>
    %cst_37 = arith.constant 0.000000e+00 : f32
    %55 = vector.shape_cast %20 : vector<1x40xi1> to vector<1x40xi1>
    %56 = vector.broadcast %55 : vector<1x40xi1> to vector<4x40xi1>
    %57 = vector.broadcast %cst_37 : f32 to vector<4x40xf32>
    %58 = arith.select %56, %54, %57 : vector<4x40xi1>, vector<4x40xf32>
    %59 = arith.truncf %58 : vector<4x40xf32> to vector<4x40xbf16>
    %c0_38 = arith.constant 0 : index
    %c128_39 = arith.constant 128 : index
    %60 = vector.load %arg10[%c0_38, %c128_39] : memref<4x176xbf16, #tpu.memory_space<vmem>>, vector<4x40xbf16>
    tpu.vector_store %arg10[%c0_38, %c128_39], %59 {strides = array<i32>} : memref<4x176xbf16, #tpu.memory_space<vmem>>, vector<4x40xbf16>,
    %c0_40 = arith.constant 0 : index
    %c0_41 = arith.constant 0 : index
    %c0_42 = arith.constant 0 : index
    %c0_43 = arith.constant 0 : index
    %61 = vector.load %arg7[%c0_40, %c0_41, %c0_42, %c0_43] : memref<3x3x4x4xbf16, #tpu.memory_space<vmem>>, vector<1x1x4x4xbf16>
    %62 = vector.shape_cast %61 : vector<1x1x4x4xbf16> to vector<4x4xbf16>
    %c0_44 = arith.constant 0 : index
    %c127_45 = arith.constant 127 : index
    %63 = vector.load %arg10[%c0_44, %c127_45] : memref<4x176xbf16, #tpu.memory_space<vmem>>, vector<4x40xbf16>
    %cst_46 = arith.constant dense<0.000000e+00> : vector<4x40xf32>
    %64 = tpu.matmul %62, %63, %cst_46 {dimension_numbers = #tpu.dot_dimension_numbers<[1], [0], [0], [1], [0, 0, 1, 1], [], []>} : vector<4x4xbf16>, vector<4x40xbf16>, vector<4x40xf32> -> vector<4x40xf32>
    %c0_47 = arith.constant 0 : index
    %c1_48 = arith.constant 1 : index
    %c0_49 = arith.constant 0 : index
    %c0_50 = arith.constant 0 : index
    %65 = vector.load %arg7[%c0_47, %c1_48, %c0_49, %c0_50] : memref<3x3x4x4xbf16, #tpu.memory_space<vmem>>, vector<1x1x4x4xbf16>
    %66 = vector.shape_cast %65 : vector<1x1x4x4xbf16> to vector<4x4xbf16>
    %c0_51 = arith.constant 0 : index
    %c128_52 = arith.constant 128 : index
    %67 = vector.load %arg10[%c0_51, %c128_52] : memref<4x176xbf16, #tpu.memory_space<vmem>>, vector<4x40xbf16>
    %cst_53 = arith.constant dense<0.000000e+00> : vector<4x40xf32>
    %68 = tpu.matmul %66, %67, %cst_53 {dimension_numbers = #tpu.dot_dimension_numbers<[1], [0], [0], [1], [0, 0, 1, 1], [], []>} : vector<4x4xbf16>, vector<4x40xbf16>, vector<4x40xf32> -> vector<4x40xf32>
    %69 = arith.addf %64, %68 : vector<4x40xf32>
    %c0_54 = arith.constant 0 : index
    %c2_55 = arith.constant 2 : index
    %c0_56 = arith.constant 0 : index
    %c0_57 = arith.constant 0 : index
    %70 = vector.load %arg7[%c0_54, %c2_55, %c0_56, %c0_57] : memref<3x3x4x4xbf16, #tpu.memory_space<vmem>>, vector<1x1x4x4xbf16>
    %71 = vector.shape_cast %70 : vector<1x1x4x4xbf16> to vector<4x4xbf16>
    %c0_58 = arith.constant 0 : index
    %c129_59 = arith.constant 129 : index
    %72 = vector.load %arg10[%c0_58, %c129_59] : memref<4x176xbf16, #tpu.memory_space<vmem>>, vector<4x40xbf16>
    %cst_60 = arith.constant dense<0.000000e+00> : vector<4x40xf32>
    %73 = tpu.matmul %71, %72, %cst_60 {dimension_numbers = #tpu.dot_dimension_numbers<[1], [0], [0], [1], [0, 0, 1, 1], [], []>} : vector<4x4xbf16>, vector<4x40xbf16>, vector<4x40xf32> -> vector<4x40xf32>
    %74 = arith.addf %69, %73 : vector<4x40xf32>
    %c0_61 = arith.constant 0 : index
    %c0_62 = arith.constant 0 : index
    %c0_63 = arith.constant 0 : index
    %75 = vector.load %arg8[%c0_61, %c0_62, %c0_63] : memref<3x4x1xf32, #tpu.memory_space<vmem>>, vector<1x4x1xf32>
    %76 = vector.shape_cast %75 : vector<1x4x1xf32> to vector<4x1xf32>
    %77 = vector.broadcast %76 : vector<4x1xf32> to vector<4x40xf32>
    %78 = arith.addf %74, %77 : vector<4x40xf32>
    %79 = arith.addf %78, %10 : vector<4x40xf32>
    %cst_64 = arith.constant 0.000000e+00 : f32
    %80 = vector.broadcast %cst_64 : f32 to vector<4x40xf32>
    %81 = arith.cmpf oge, %79, %80 : vector<4x40xf32>
    %cst_65 = arith.constant 1.000000e-01 : f32
    %82 = vector.broadcast %cst_65 : f32 to vector<4x40xf32>
    %83 = arith.mulf %79, %82 : vector<4x40xf32>
    %84 = arith.select %81, %79, %83 : vector<4x40xi1>, vector<4x40xf32>
    %cst_66 = arith.constant 0.000000e+00 : f32
    %85 = vector.shape_cast %20 : vector<1x40xi1> to vector<1x40xi1>
    %86 = vector.broadcast %85 : vector<1x40xi1> to vector<4x40xi1>
    %87 = vector.broadcast %cst_66 : f32 to vector<4x40xf32>
    %88 = arith.select %86, %84, %87 : vector<4x40xi1>, vector<4x40xf32>
    %89 = arith.truncf %88 : vector<4x40xf32> to vector<4x40xbf16>
    %c0_67 = arith.constant 0 : index
    %c128_68 = arith.constant 128 : index
    %90 = vector.load %arg10[%c0_67, %c128_68] : memref<4x176xbf16, #tpu.memory_space<vmem>>, vector<4x40xbf16>
    tpu.vector_store %arg10[%c0_67, %c128_68], %89 {strides = array<i32>} : memref<4x176xbf16, #tpu.memory_space<vmem>>, vector<4x40xbf16>,
    %c1_69 = arith.constant 1 : index
    %c0_70 = arith.constant 0 : index
    %c0_71 = arith.constant 0 : index
    %c0_72 = arith.constant 0 : index
    %91 = vector.load %arg5[%c1_69, %c0_70, %c0_71, %c0_72] : memref<3x3x4x4xbf16, #tpu.memory_space<vmem>>, vector<1x1x4x4xbf16>
    %92 = vector.shape_cast %91 : vector<1x1x4x4xbf16> to vector<4x4xbf16>
    %c0_73 = arith.constant 0 : index
    %c125 = arith.constant 125 : index
    %93 = vector.load %arg10[%c0_73, %c125] : memref<4x176xbf16, #tpu.memory_space<vmem>>, vector<4x40xbf16>
    %cst_74 = arith.constant dense<0.000000e+00> : vector<4x40xf32>
    %94 = tpu.matmul %92, %93, %cst_74 {dimension_numbers = #tpu.dot_dimension_numbers<[1], [0], [0], [1], [0, 0, 1, 1], [], []>} : vector<4x4xbf16>, vector<4x40xbf16>, vector<4x40xf32> -> vector<4x40xf32>
    %c1_75 = arith.constant 1 : index
    %c1_76 = arith.constant 1 : index
    %c0_77 = arith.constant 0 : index
    %c0_78 = arith.constant 0 : index
    %95 = vector.load %arg5[%c1_75, %c1_76, %c0_77, %c0_78] : memref<3x3x4x4xbf16, #tpu.memory_space<vmem>>, vector<1x1x4x4xbf16>
    %96 = vector.shape_cast %95 : vector<1x1x4x4xbf16> to vector<4x4xbf16>
    %c0_79 = arith.constant 0 : index
    %c128_80 = arith.constant 128 : index
    %97 = vector.load %arg10[%c0_79, %c128_80] : memref<4x176xbf16, #tpu.memory_space<vmem>>, vector<4x40xbf16>
    %cst_81 = arith.constant dense<0.000000e+00> : vector<4x40xf32>
    %98 = tpu.matmul %96, %97, %cst_81 {dimension_numbers = #tpu.dot_dimension_numbers<[1], [0], [0], [1], [0, 0, 1, 1], [], []>} : vector<4x4xbf16>, vector<4x40xbf16>, vector<4x40xf32> -> vector<4x40xf32>
    %99 = arith.addf %94, %98 : vector<4x40xf32>
    %c1_82 = arith.constant 1 : index
    %c2_83 = arith.constant 2 : index
    %c0_84 = arith.constant 0 : index
    %c0_85 = arith.constant 0 : index
    %100 = vector.load %arg5[%c1_82, %c2_83, %c0_84, %c0_85] : memref<3x3x4x4xbf16, #tpu.memory_space<vmem>>, vector<1x1x4x4xbf16>
    %101 = vector.shape_cast %100 : vector<1x1x4x4xbf16> to vector<4x4xbf16>
    %c0_86 = arith.constant 0 : index
    %c131 = arith.constant 131 : index
    %102 = vector.load %arg10[%c0_86, %c131] : memref<4x176xbf16, #tpu.memory_space<vmem>>, vector<4x40xbf16>
    %cst_87 = arith.constant dense<0.000000e+00> : vector<4x40xf32>
    %103 = tpu.matmul %101, %102, %cst_87 {dimension_numbers = #tpu.dot_dimension_numbers<[1], [0], [0], [1], [0, 0, 1, 1], [], []>} : vector<4x4xbf16>, vector<4x40xbf16>, vector<4x40xf32> -> vector<4x40xf32>
    %104 = arith.addf %99, %103 : vector<4x40xf32>
    %c1_88 = arith.constant 1 : index
    %c0_89 = arith.constant 0 : index
    %c0_90 = arith.constant 0 : index
    %105 = vector.load %arg6[%c1_88, %c0_89, %c0_90] : memref<3x4x1xf32, #tpu.memory_space<vmem>>, vector<1x4x1xf32>
    %106 = vector.shape_cast %105 : vector<1x4x1xf32> to vector<4x1xf32>
    %107 = vector.broadcast %106 : vector<4x1xf32> to vector<4x40xf32>
    %108 = arith.addf %104, %107 : vector<4x40xf32>
    %cst_91 = arith.constant 0.000000e+00 : f32
    %109 = vector.broadcast %cst_91 : f32 to vector<4x40xf32>
    %110 = arith.cmpf oge, %108, %109 : vector<4x40xf32>
    %cst_92 = arith.constant 1.000000e-01 : f32
    %111 = vector.broadcast %cst_92 : f32 to vector<4x40xf32>
    %112 = arith.mulf %108, %111 : vector<4x40xf32>
    %113 = arith.select %110, %108, %112 : vector<4x40xi1>, vector<4x40xf32>
    %cst_93 = arith.constant 0.000000e+00 : f32
    %114 = vector.shape_cast %20 : vector<1x40xi1> to vector<1x40xi1>
    %115 = vector.broadcast %114 : vector<1x40xi1> to vector<4x40xi1>
    %116 = vector.broadcast %cst_93 : f32 to vector<4x40xf32>
    %117 = arith.select %115, %113, %116 : vector<4x40xi1>, vector<4x40xf32>
    %118 = arith.truncf %117 : vector<4x40xf32> to vector<4x40xbf16>
    %c0_94 = arith.constant 0 : index
    %c128_95 = arith.constant 128 : index
    %119 = vector.load %arg10[%c0_94, %c128_95] : memref<4x176xbf16, #tpu.memory_space<vmem>>, vector<4x40xbf16>
    tpu.vector_store %arg10[%c0_94, %c128_95], %118 {strides = array<i32>} : memref<4x176xbf16, #tpu.memory_space<vmem>>, vector<4x40xbf16>,
    %c1_96 = arith.constant 1 : index
    %c0_97 = arith.constant 0 : index
    %c0_98 = arith.constant 0 : index
    %c0_99 = arith.constant 0 : index
    %120 = vector.load %arg7[%c1_96, %c0_97, %c0_98, %c0_99] : memref<3x3x4x4xbf16, #tpu.memory_space<vmem>>, vector<1x1x4x4xbf16>
    %121 = vector.shape_cast %120 : vector<1x1x4x4xbf16> to vector<4x4xbf16>
    %c0_100 = arith.constant 0 : index
    %c127_101 = arith.constant 127 : index
    %122 = vector.load %arg10[%c0_100, %c127_101] : memref<4x176xbf16, #tpu.memory_space<vmem>>, vector<4x40xbf16>
    %cst_102 = arith.constant dense<0.000000e+00> : vector<4x40xf32>
    %123 = tpu.matmul %121, %122, %cst_102 {dimension_numbers = #tpu.dot_dimension_numbers<[1], [0], [0], [1], [0, 0, 1, 1], [], []>} : vector<4x4xbf16>, vector<4x40xbf16>, vector<4x40xf32> -> vector<4x40xf32>
    %c1_103 = arith.constant 1 : index
    %c1_104 = arith.constant 1 : index
    %c0_105 = arith.constant 0 : index
    %c0_106 = arith.constant 0 : index
    %124 = vector.load %arg7[%c1_103, %c1_104, %c0_105, %c0_106] : memref<3x3x4x4xbf16, #tpu.memory_space<vmem>>, vector<1x1x4x4xbf16>
    %125 = vector.shape_cast %124 : vector<1x1x4x4xbf16> to vector<4x4xbf16>
    %c0_107 = arith.constant 0 : index
    %c128_108 = arith.constant 128 : index
    %126 = vector.load %arg10[%c0_107, %c128_108] : memref<4x176xbf16, #tpu.memory_space<vmem>>, vector<4x40xbf16>
    %cst_109 = arith.constant dense<0.000000e+00> : vector<4x40xf32>
    %127 = tpu.matmul %125, %126, %cst_109 {dimension_numbers = #tpu.dot_dimension_numbers<[1], [0], [0], [1], [0, 0, 1, 1], [], []>} : vector<4x4xbf16>, vector<4x40xbf16>, vector<4x40xf32> -> vector<4x40xf32>
    %128 = arith.addf %123, %127 : vector<4x40xf32>
    %c1_110 = arith.constant 1 : index
    %c2_111 = arith.constant 2 : index
    %c0_112 = arith.constant 0 : index
    %c0_113 = arith.constant 0 : index
    %129 = vector.load %arg7[%c1_110, %c2_111, %c0_112, %c0_113] : memref<3x3x4x4xbf16, #tpu.memory_space<vmem>>, vector<1x1x4x4xbf16>
    %130 = vector.shape_cast %129 : vector<1x1x4x4xbf16> to vector<4x4xbf16>
    %c0_114 = arith.constant 0 : index
    %c129_115 = arith.constant 129 : index
    %131 = vector.load %arg10[%c0_114, %c129_115] : memref<4x176xbf16, #tpu.memory_space<vmem>>, vector<4x40xbf16>
    %cst_116 = arith.constant dense<0.000000e+00> : vector<4x40xf32>
    %132 = tpu.matmul %130, %131, %cst_116 {dimension_numbers = #tpu.dot_dimension_numbers<[1], [0], [0], [1], [0, 0, 1, 1], [], []>} : vector<4x4xbf16>, vector<4x40xbf16>, vector<4x40xf32> -> vector<4x40xf32>
    %133 = arith.addf %128, %132 : vector<4x40xf32>
    %c1_117 = arith.constant 1 : index
    %c0_118 = arith.constant 0 : index
    %c0_119 = arith.constant 0 : index
    %134 = vector.load %arg8[%c1_117, %c0_118, %c0_119] : memref<3x4x1xf32, #tpu.memory_space<vmem>>, vector<1x4x1xf32>
    %135 = vector.shape_cast %134 : vector<1x4x1xf32> to vector<4x1xf32>
    %136 = vector.broadcast %135 : vector<4x1xf32> to vector<4x40xf32>
    %137 = arith.addf %133, %136 : vector<4x40xf32>
    %138 = arith.addf %137, %79 : vector<4x40xf32>
    %cst_120 = arith.constant 0.000000e+00 : f32
    %139 = vector.broadcast %cst_120 : f32 to vector<4x40xf32>
    %140 = arith.cmpf oge, %138, %139 : vector<4x40xf32>
    %cst_121 = arith.constant 1.000000e-01 : f32
    %141 = vector.broadcast %cst_121 : f32 to vector<4x40xf32>
    %142 = arith.mulf %138, %141 : vector<4x40xf32>
    %143 = arith.select %140, %138, %142 : vector<4x40xi1>, vector<4x40xf32>
    %cst_122 = arith.constant 0.000000e+00 : f32
    %144 = vector.shape_cast %20 : vector<1x40xi1> to vector<1x40xi1>
    %145 = vector.broadcast %144 : vector<1x40xi1> to vector<4x40xi1>
    %146 = vector.broadcast %cst_122 : f32 to vector<4x40xf32>
    %147 = arith.select %145, %143, %146 : vector<4x40xi1>, vector<4x40xf32>
    %148 = arith.truncf %147 : vector<4x40xf32> to vector<4x40xbf16>
    %c0_123 = arith.constant 0 : index
    %c128_124 = arith.constant 128 : index
    %149 = vector.load %arg10[%c0_123, %c128_124] : memref<4x176xbf16, #tpu.memory_space<vmem>>, vector<4x40xbf16>
    tpu.vector_store %arg10[%c0_123, %c128_124], %148 {strides = array<i32>} : memref<4x176xbf16, #tpu.memory_space<vmem>>, vector<4x40xbf16>,
    %c2_125 = arith.constant 2 : index
    %c0_126 = arith.constant 0 : index
    %c0_127 = arith.constant 0 : index
    %c0_128 = arith.constant 0 : index
    %150 = vector.load %arg5[%c2_125, %c0_126, %c0_127, %c0_128] : memref<3x3x4x4xbf16, #tpu.memory_space<vmem>>, vector<1x1x4x4xbf16>
    %151 = vector.shape_cast %150 : vector<1x1x4x4xbf16> to vector<4x4xbf16>
    %c0_129 = arith.constant 0 : index
    %c123_130 = arith.constant 123 : index
    %152 = vector.load %arg10[%c0_129, %c123_130] : memref<4x176xbf16, #tpu.memory_space<vmem>>, vector<4x40xbf16>
    %cst_131 = arith.constant dense<0.000000e+00> : vector<4x40xf32>
    %153 = tpu.matmul %151, %152, %cst_131 {dimension_numbers = #tpu.dot_dimension_numbers<[1], [0], [0], [1], [0, 0, 1, 1], [], []>} : vector<4x4xbf16>, vector<4x40xbf16>, vector<4x40xf32> -> vector<4x40xf32>
    %c2_132 = arith.constant 2 : index
    %c1_133 = arith.constant 1 : index
    %c0_134 = arith.constant 0 : index
    %c0_135 = arith.constant 0 : index
    %154 = vector.load %arg5[%c2_132, %c1_133, %c0_134, %c0_135] : memref<3x3x4x4xbf16, #tpu.memory_space<vmem>>, vector<1x1x4x4xbf16>
    %155 = vector.shape_cast %154 : vector<1x1x4x4xbf16> to vector<4x4xbf16>
    %c0_136 = arith.constant 0 : index
    %c128_137 = arith.constant 128 : index
    %156 = vector.load %arg10[%c0_136, %c128_137] : memref<4x176xbf16, #tpu.memory_space<vmem>>, vector<4x40xbf16>
    %cst_138 = arith.constant dense<0.000000e+00> : vector<4x40xf32>
    %157 = tpu.matmul %155, %156, %cst_138 {dimension_numbers = #tpu.dot_dimension_numbers<[1], [0], [0], [1], [0, 0, 1, 1], [], []>} : vector<4x4xbf16>, vector<4x40xbf16>, vector<4x40xf32> -> vector<4x40xf32>
    %158 = arith.addf %153, %157 : vector<4x40xf32>
    %c2_139 = arith.constant 2 : index
    %c2_140 = arith.constant 2 : index
    %c0_141 = arith.constant 0 : index
    %c0_142 = arith.constant 0 : index
    %159 = vector.load %arg5[%c2_139, %c2_140, %c0_141, %c0_142] : memref<3x3x4x4xbf16, #tpu.memory_space<vmem>>, vector<1x1x4x4xbf16>
    %160 = vector.shape_cast %159 : vector<1x1x4x4xbf16> to vector<4x4xbf16>
    %c0_143 = arith.constant 0 : index
    %c133 = arith.constant 133 : index
    %161 = vector.load %arg10[%c0_143, %c133] : memref<4x176xbf16, #tpu.memory_space<vmem>>, vector<4x40xbf16>
    %cst_144 = arith.constant dense<0.000000e+00> : vector<4x40xf32>
    %162 = tpu.matmul %160, %161, %cst_144 {dimension_numbers = #tpu.dot_dimension_numbers<[1], [0], [0], [1], [0, 0, 1, 1], [], []>} : vector<4x4xbf16>, vector<4x40xbf16>, vector<4x40xf32> -> vector<4x40xf32>
    %163 = arith.addf %158, %162 : vector<4x40xf32>
    %c2_145 = arith.constant 2 : index
    %c0_146 = arith.constant 0 : index
    %c0_147 = arith.constant 0 : index
    %164 = vector.load %arg6[%c2_145, %c0_146, %c0_147] : memref<3x4x1xf32, #tpu.memory_space<vmem>>, vector<1x4x1xf32>
    %165 = vector.shape_cast %164 : vector<1x4x1xf32> to vector<4x1xf32>
    %166 = vector.broadcast %165 : vector<4x1xf32> to vector<4x40xf32>
    %167 = arith.addf %163, %166 : vector<4x40xf32>
    %cst_148 = arith.constant 0.000000e+00 : f32
    %168 = vector.broadcast %cst_148 : f32 to vector<4x40xf32>
    %169 = arith.cmpf oge, %167, %168 : vector<4x40xf32>
    %cst_149 = arith.constant 1.000000e-01 : f32
    %170 = vector.broadcast %cst_149 : f32 to vector<4x40xf32>
    %171 = arith.mulf %167, %170 : vector<4x40xf32>
    %172 = arith.select %169, %167, %171 : vector<4x40xi1>, vector<4x40xf32>
    %cst_150 = arith.constant 0.000000e+00 : f32
    %173 = vector.shape_cast %20 : vector<1x40xi1> to vector<1x40xi1>
    %174 = vector.broadcast %173 : vector<1x40xi1> to vector<4x40xi1>
    %175 = vector.broadcast %cst_150 : f32 to vector<4x40xf32>
    %176 = arith.select %174, %172, %175 : vector<4x40xi1>, vector<4x40xf32>
    %177 = arith.truncf %176 : vector<4x40xf32> to vector<4x40xbf16>
    %c0_151 = arith.constant 0 : index
    %c128_152 = arith.constant 128 : index
    %178 = vector.load %arg10[%c0_151, %c128_152] : memref<4x176xbf16, #tpu.memory_space<vmem>>, vector<4x40xbf16>
    tpu.vector_store %arg10[%c0_151, %c128_152], %177 {strides = array<i32>} : memref<4x176xbf16, #tpu.memory_space<vmem>>, vector<4x40xbf16>,
    %c2_153 = arith.constant 2 : index
    %c0_154 = arith.constant 0 : index
    %c0_155 = arith.constant 0 : index
    %c0_156 = arith.constant 0 : index
    %179 = vector.load %arg7[%c2_153, %c0_154, %c0_155, %c0_156] : memref<3x3x4x4xbf16, #tpu.memory_space<vmem>>, vector<1x1x4x4xbf16>
    %180 = vector.shape_cast %179 : vector<1x1x4x4xbf16> to vector<4x4xbf16>
    %c0_157 = arith.constant 0 : index
    %c127_158 = arith.constant 127 : index
    %181 = vector.load %arg10[%c0_157, %c127_158] : memref<4x176xbf16, #tpu.memory_space<vmem>>, vector<4x40xbf16>
    %cst_159 = arith.constant dense<0.000000e+00> : vector<4x40xf32>
    %182 = tpu.matmul %180, %181, %cst_159 {dimension_numbers = #tpu.dot_dimension_numbers<[1], [0], [0], [1], [0, 0, 1, 1], [], []>} : vector<4x4xbf16>, vector<4x40xbf16>, vector<4x40xf32> -> vector<4x40xf32>
    %c2_160 = arith.constant 2 : index
    %c1_161 = arith.constant 1 : index
    %c0_162 = arith.constant 0 : index
    %c0_163 = arith.constant 0 : index
    %183 = vector.load %arg7[%c2_160, %c1_161, %c0_162, %c0_163] : memref<3x3x4x4xbf16, #tpu.memory_space<vmem>>, vector<1x1x4x4xbf16>
    %184 = vector.shape_cast %183 : vector<1x1x4x4xbf16> to vector<4x4xbf16>
    %c0_164 = arith.constant 0 : index
    %c128_165 = arith.constant 128 : index
    %185 = vector.load %arg10[%c0_164, %c128_165] : memref<4x176xbf16, #tpu.memory_space<vmem>>, vector<4x40xbf16>
    %cst_166 = arith.constant dense<0.000000e+00> : vector<4x40xf32>
    %186 = tpu.matmul %184, %185, %cst_166 {dimension_numbers = #tpu.dot_dimension_numbers<[1], [0], [0], [1], [0, 0, 1, 1], [], []>} : vector<4x4xbf16>, vector<4x40xbf16>, vector<4x40xf32> -> vector<4x40xf32>
    %187 = arith.addf %182, %186 : vector<4x40xf32>
    %c2_167 = arith.constant 2 : index
    %c2_168 = arith.constant 2 : index
    %c0_169 = arith.constant 0 : index
    %c0_170 = arith.constant 0 : index
    %188 = vector.load %arg7[%c2_167, %c2_168, %c0_169, %c0_170] : memref<3x3x4x4xbf16, #tpu.memory_space<vmem>>, vector<1x1x4x4xbf16>
    %189 = vector.shape_cast %188 : vector<1x1x4x4xbf16> to vector<4x4xbf16>
    %c0_171 = arith.constant 0 : index
    %c129_172 = arith.constant 129 : index
    %190 = vector.load %arg10[%c0_171, %c129_172] : memref<4x176xbf16, #tpu.memory_space<vmem>>, vector<4x40xbf16>
    %cst_173 = arith.constant dense<0.000000e+00> : vector<4x40xf32>
    %191 = tpu.matmul %189, %190, %cst_173 {dimension_numbers = #tpu.dot_dimension_numbers<[1], [0], [0], [1], [0, 0, 1, 1], [], []>} : vector<4x4xbf16>, vector<4x40xbf16>, vector<4x40xf32> -> vector<4x40xf32>
    %192 = arith.addf %187, %191 : vector<4x40xf32>
    %c2_174 = arith.constant 2 : index
    %c0_175 = arith.constant 0 : index
    %c0_176 = arith.constant 0 : index
    %193 = vector.load %arg8[%c2_174, %c0_175, %c0_176] : memref<3x4x1xf32, #tpu.memory_space<vmem>>, vector<1x4x1xf32>
    %194 = vector.shape_cast %193 : vector<1x4x1xf32> to vector<4x1xf32>
    %195 = vector.broadcast %194 : vector<4x1xf32> to vector<4x40xf32>
    %196 = arith.addf %192, %195 : vector<4x40xf32>
    %197 = arith.addf %196, %138 : vector<4x40xf32>
    %198 = vector.extract_strided_slice %197 {offsets = [0, 12], sizes = [4, 16], strides = [1, 1]} : vector<4x40xf32> to vector<4x16xf32>
    %c0_177 = arith.constant 0 : index
    %c0_178 = arith.constant 0 : index
    %c0_179 = arith.constant 0 : index
    %199 = vector.load %arg9[%c0_177, %c0_178, %c0_179] : memref<1x4x16xf32, #tpu.memory_space<vmem>>, vector<1x4x16xf32>
    %200 = vector.shape_cast %199 : vector<1x4x16xf32> to vector<4x16xf32>
    %201 = vector.shape_cast %198 : vector<4x16xf32> to vector<1x4x16xf32>
    tpu.vector_store %arg9[%c0_177, %c0_178, %c0_179], %201 {strides = array<i32>} : memref<1x4x16xf32, #tpu.memory_space<vmem>>, vector<1x4x16xf32>,
    return
  }
  func.func @transform_0(%arg0: i32, %arg1: i32) -> (i32, i32, i32) {
    %c0_i32 = arith.constant 0 : i32
    %c0_i32_0 = arith.constant 0 : i32
    return %arg0, %c0_i32, %arg1 : i32, i32, i32
  }
  func.func @transform_1(%arg0: i32, %arg1: i32) -> (i32, i32, i32) {
    %c1_i32 = arith.constant 1 : i32
    %0 = arith.muli %arg1, %c1_i32 : i32
    %c1_i32_0 = arith.constant 1 : i32
    %1 = arith.subi %0, %c1_i32_0 : i32
    %c0_i32 = arith.constant 0 : i32
    %2 = arith.maxsi %1, %c0_i32 : i32
    %c0_i32_1 = arith.constant 0 : i32
    %c0_i32_2 = arith.constant 0 : i32
    return %arg0, %c0_i32_1, %2 : i32, i32, i32
  }
  func.func @transform_2(%arg0: i32, %arg1: i32) -> (i32, i32, i32) {
    %c1_i32 = arith.constant 1 : i32
    %0 = arith.addi %arg1, %c1_i32 : i32
    %c1_i32_0 = arith.constant 1 : i32
    %1 = arith.muli %0, %c1_i32_0 : i32
    %c0_i32 = arith.constant 0 : i32
    %2 = arith.minsi %1, %c0_i32 : i32
    %c0_i32_1 = arith.constant 0 : i32
    %c0_i32_2 = arith.constant 0 : i32
    return %arg0, %c0_i32_1, %2 : i32, i32, i32
  }
  func.func @transform_3(%arg0: i32, %arg1: i32) -> (i32, i32, i32, i32) {
    %c0_i32 = arith.constant 0 : i32
    %c0_i32_0 = arith.constant 0 : i32
    %c0_i32_1 = arith.constant 0 : i32
    %c0_i32_2 = arith.constant 0 : i32
    %c0_i32_3 = arith.constant 0 : i32
    return %c0_i32, %c0_i32_0, %c0_i32_1, %c0_i32_2 : i32, i32, i32, i32
  }
  func.func @transform_4(%arg0: i32, %arg1: i32) -> (i32, i32, i32) {
    %c0_i32 = arith.constant 0 : i32
    %c0_i32_0 = arith.constant 0 : i32
    %c0_i32_1 = arith.constant 0 : i32
    %c0_i32_2 = arith.constant 0 : i32
    return %c0_i32, %c0_i32_0, %c0_i32_1 : i32, i32, i32
  }
  func.func @transform_5(%arg0: i32, %arg1: i32) -> (i32, i32, i32, i32) {
    %c0_i32 = arith.constant 0 : i32
    %c0_i32_0 = arith.constant 0 : i32
    %c0_i32_1 = arith.constant 0 : i32
    %c0_i32_2 = arith.constant 0 : i32
    %c0_i32_3 = arith.constant 0 : i32
    return %c0_i32, %c0_i32_0, %c0_i32_1, %c0_i32_2 : i32, i32, i32, i32
  }
  func.func @transform_6(%arg0: i32, %arg1: i32) -> (i32, i32, i32) {
    %c0_i32 = arith.constant 0 : i32
    %c0_i32_0 = arith.constant 0 : i32
    %c0_i32_1 = arith.constant 0 : i32
    %c0_i32_2 = arith.constant 0 : i32
    return %c0_i32, %c0_i32_0, %c0_i32_1 : i32, i32, i32
  }
  func.func @transform_7(%arg0: i32, %arg1: i32) -> (i32, i32, i32) {
    %c0_i32 = arith.constant 0 : i32
    %c0_i32_0 = arith.constant 0 : i32
    return %arg0, %c0_i32, %arg1 : i32, i32, i32
  }
}

</mosaic_0001>

<bundles_post_ra>
// kernel: resblock1.1
= control target key start
LH: loop header
LB: loop body
LE: loop exit
PB: predicated region body
PF: predicated region fallthrough
CT: control target
= control target key end

     0   :  { %12 = vsyncpa [#allocation4], 0  ;;  %s1667_s0 = inlined_call_operand.vmem [shape: f32[2,4,16], index: 0, kind: input, shape index: {}, may-alias: {0,1,2}]   ;;  %s1668_s1 = inlined_call_operand.vmem [shape: f32[2,4,16], index: 1, kind: input, shape index: {}, may-alias: {0,1,2}]   ;;  %s1669_s2 = inlined_call_operand.vmem [shape: f32[2,4,16], index: 2, kind: input, shape index: {}, may-alias: {0,1,2}]   ;;  %s1670_s3 = inlined_call_operand.vmem [shape: bf16[3,3,4,4], index: 3, kind: input, shape index: {}]   ;;  %s1671_s4 = inlined_call_operand.vmem [shape: f32[3,4,1], index: 4, kind: input, shape index: {}]   ;;  %s1672_s5 = inlined_call_operand.vmem [shape: bf16[3,3,4,4], index: 5, kind: input, shape index: {}]   ;;  %s1673_s6 = inlined_call_operand.vmem [shape: f32[3,4,1], index: 6, kind: input, shape index: {}]   ;;  %s1674_s7 = inlined_call_operand.hbm [shape: f32[2,4,16], index: 7, kind: output, shape index: {}]  }
   0x1   :  { %14 = vsyncpa [#allocation4 + $0x1], 0  ;;  %s1400_s24 = smov 0   ;;  %s1402_s25 = smov 0  }
   0x2   :  { %s1404_s26 = smov 0   ;;  %s1406_s27 = smov 0  }
   0x3   :  { %s1408_s28 = smov 0   ;;  %s1410_s29 = smov 0  }
   0x4 LB: > { %s1149_s30 = sadd.s32 4294967295, %s1347_s29   ;;  %s1150_s8 = sadd.s32 4294967294, %s1347_s29   ;;  %s1347_s29 = sphi %s1410_s29, %s20_s29   ;;  %s1343_s28 = sphi %s1408_s28, %s1683_s28   ;;  %s1339_s27 = sphi %s1406_s27, %s1682_s27   ;;  %s1335_s26 = sphi %s1404_s26, %s1681_s26   ;;  %s1331_s25 = sphi %s1402_s25, %s1680_s25   ;;  %s1327_s24 = sphi %s1400_s24, %s1679_s24  }
   0x5   : > { %s32_s9 = sadd.s32 1, %s1343_s28  ;;  %s221_s10 = sadd.s32 1, %s1335_s26 }
   0x6   : > { %p34_p0 = scmp.ge.s32.totalorder %s32_s9, 2  ;;  %p231_p1 = scmp.ne.s32.totalorder %s1335_s26, %s1331_s25 }
   0x7   : > { %p232_p2 = scmp.eq.s32.totalorder %s1149_s30, 1  ;;  %p237_p3 = scmp.ne.s32.totalorder %s1331_s25, %s1327_s24 }
   0x8   : > { %s1685_s9 = smov (%p34_p0, %s32_s9), 0  ;;  %p238_p5 = scmp.eq.s32.totalorder %s1150_s8, 1 }
   0x9   : > { %p1440_p4 = por %p232_p2, %p231_p1  ;;  %s216_s12 = ssub.s32 %s1343_s28, %s1685_s9 }
   0xa   : > { %p1153_p6 = scmp.ge.s32.totalorder %s1347_s29, 1  ;;  %p219_p7 = scmp.eq.s32.totalorder %s216_s12, 0 }
   0xb   : > { %p1447_p8 = por %p238_p5, %p237_p3  ;;  %p310_p9 = scmp.lt.s32.totalorder %s1347_s29, 3 }
   0xc   : > { %s1453_s14 = scalar_select %p219_p7, %s1335_s26, %s221_s10  }
   0xd   : > { %p311_p10 = pnand %p1153_p6, %p310_p9 }
   0xe   : > { %p364_p11 = scmp.lt.s32.totalorder (!%p311_p10), %s1339_s27, 1  ;;  %s1349_s23 = smov (!%p311_p10), 124  }
   0xf   : > { %314 = sbr.rel (%p311_p10) target bundleno = 1952 (0x7a0), region = 48  ;;  %s1350_s30 = smov (!%p311_p10), 28  }
  0x10   : > { %s1354_s17 = smov (!%p311_p10), 127   ;;  %s1356_s10 = smov (!%p311_p10), 125  }
  0x11   : > { %s1358_s20 = smov (!%p311_p10), 123   ;;  %s361_s8 = sand.u32 (!%p311_p10), 1, %s1331_s25  }
  0x14   : > { %s365_s15 = scalar_select %p364_p11, %s1339_s27, 1  ;;  %vm398_vm0 = vcmask 1042392   ;;  %vm400_vm1 = vcmask 361792   ;;  %v1352_v3 = vmov 0   ;;  %v421_v4 = vlaneseq  ;;  %v1158_v25 = vld [vmem:[%s1670_s3 + $0x2] sm:$0x3] }
  0x15   : > { %399 = vst.msk [vmem:[#allocation2] sm:$0x3] %vm398_vm0, %v1352_v3  ;;  %1266 = vset.pattern.permute.xlu0 %v1352_v3  ;;  %1267 = vset.pattern.permute.xlu2 %v1352_v3  ;;  %vm417_vm2 = vcmask 97280   ;;  %vm419_vm3 = vcmask 228352   ;;  %vm437_vm8 = vcmask 320512   ;;  %vm448_vm9 = vcmask 1041408  }
  0x16   : > { %s1155_s16 = sshll.u32 %s365_s15, 2  ;;  %s1351_s15 = smov 12   ;;  %401 = vst.msk [vmem:[#allocation2 + $0x2] sm:$0x3] %vm400_vm1, %v1352_v3  ;;  %1268 = vset.pattern.permute.xlu1 %v1352_v3  ;;  %v422_v6 = vand.u32 127, %v421_v4  ;;  %vm444_vm10 = vcmask 31744  }
  0x17   : > { %s380_s19 = scalar_lea.vmem %s1668_s1, %s1155_s16  ;;  %s393_s22 = scalar_lea.vmem %s1669_s2, %s1155_s16  ;;  %v525_v26 = vld [vmem:[%s1671_s4] sm:$0xf]  ;;  %vm475_vm11 = vcmask 7168   ;;  %v1161_v33 = vld [vmem:[%s1670_s3 + $0x4] sm:$0x3]  ;;  %vm670_vm14 = vcmask 23552  }
  0x18   : > { %v402_v0 = vld [vmem:[%s380_s19] sm:$0xf]  ;;  %s370_s12 = scalar_lea.vmem %s1667_s0, %s1155_s16  ;;  %v426_v7 = vadd.s32 4294967284, %v422_v6  ;;  %s1353_s16 = smov 1   ;;  %vm868_vm1 = vcmask 39936  }
  0x19   : > { %406 = vrot.lane.b32.xlu0 %v402_v0, %s1349_s23  ;;  %v404_v1 = vld [vmem:[%s393_s22] sm:$0xf]  ;;  %v1166_v0 = vld [vmem:[%s1672_s5 + $0x4] sm:$0x3]  ;;  %s1355_s23 = smov 3   ;;  %s1357_s19 = smov 5  }
  0x1a   : > { %414 = vrot.lane.b32.xlu1 %v404_v1, %s1350_s30  ;;  %v403_v2 = vld [vmem:[%s370_s12] sm:$0xf]  ;;  %vm427_vm4 = vcmp.ge.s32.totalorder %v426_v7, 0  ;;  %vm428_vm5 = vcmp.lt.s32.totalorder %v426_v7, 16  ;;  %v1195_v12 = vld [vmem:[%s1673_s6 + $0x8] sm:$0xf] }
  0x1b   : > { %vm1468_vm6 = vmand %vm427_vm4, %vm428_vm5  ;;  %v439_v30 = vld [vmem:[%s1670_s3] sm:$0x3]  ;;  %v1163_v55 = vld [vmem:[%s1672_s5 + $0x2] sm:$0x3]  ;;  %s1359_s30 = smov 116   ;;  %s1197_s12 = sshll.u32 %s1339_s27, 2 }
  0x1c   : > { %v621_v56 = vld [vmem:[%s1673_s6] sm:$0xf]  ;;  %s1032_s22 = scalar_lea.sflag [#allocation4], %s361_s8 }
  0x1d   : > { %v538_v61 = vld [vmem:[%s1672_s5] sm:$0x3] }
  0x21   : > { %410 = vrot.lane.b32.xlu0 %v403_v2, %s1351_s15 }
  0x29   : > { %528 = vperm.xlu0 %1266, %v525_v26  }
  0x8b   : > { %v407_v5 = vpop.permute.xlu0 %406 }
  0x8c   : > { %v415_v8 = vpop.permute.xlu1 %414 }
  0x93   : > { %v411_v9 = vpop.permute.xlu0 %410 }
  0x94   : > { %v418_v10 = vsel %vm417_vm2, %v407_v5, %v411_v9 }
  0x95   : > { %v1466_v11 = vsel %vm419_vm3, %v418_v10, %v415_v8  ;;  %vm1029_vm3 = vcmask 125952  }
  0x96   : > { %vm430_vm7 = vcmp.ge.f32.partialorder %v1466_v11, 0.0  ;;  %v431_v13 = vmul.f32 0.1, %v1466_v11 }
  0x98   : > { %v432_v14 = vsel %vm430_vm7, %v1466_v11, %v431_v13 }
  0x99   : > { %v435_v15 = vsel %vm1468_vm6, %v432_v14, 0.0 }
  0x9a   : > { %v436_v16 = vpack.c.bf16 %v435_v15, %v435_v15 }
  0x9b   : > { %v529_v40 = vpop.permute.xlu0 %528 }
  0x9c   : > { %438 = vst.msk [vmem:[#allocation2 + $0x2] sm:$0x3] %vm437_vm8, %v436_v16 }
  0xa3   : > { %v440_v17 = vld [vmem:[#allocation2] sm:$0xf] }
  0xa4   : > { %v443_v18 = vld [vmem:[#allocation2 + $0x2] sm:$0x3]  ;;  %466 = vst [vmem:[#allocation1] ss:$4 sm:$0xff] %v440_v17 }
  0xa5   : > { %v450_v19 = vsel %vm448_vm9, %v443_v18, 0  ;;  %v498_v20 = vld [vmem:[#allocation2 + $0x2] sm:$0x3] }
  0xa6   : > { %459 = vmatpush.bf16.msra.mxu0 %v450_v19 }
  0xa9   : > { %1159 = vmatmul.msk.bf16.vlgmr.msra.gmra.mxu0 %vm444_vm10, %v1158_v25  ;;  %v1169_v25 = vld [vmem:[%s1670_s3 + $0x8] sm:$0x3] }
  0xab   : > { %v467_v21 = vld.sshfl [vmem:[#allocation1] sm:$0xff pattern:$0x73625140]  ;;  %v469_v22 = vld.sshfl [vmem:[#allocation1 + $0x8] sm:$0xff pattern:$0x73625140] }
  0xac   : > { %471 = vrot.lane.b32.xlu2 %v467_v21, %s1353_s16  ;;  %500 = vst [vmem:[#allocation1] ss:$4 sm:$0xff] %v498_v20 }
  0xb3   : > { %v501_v23 = vld.sshfl [vmem:[#allocation1] sm:$0xff pattern:$0x73625140] }
  0xb4   : > { %473 = vrot.lane.b32.xlu2 %v469_v22, %s1353_s16  ;;  %503 = vrot.lane.b32.xlu1 %v501_v23, %s1354_s17  ;;  %v1174_v23 = vld [vmem:[%s1671_s4 + $0x4] sm:$0xf] }
 0x106   : > { %v472_v24 = vpop.permute.xlu2 %471 }
 0x10e   : > { %v474_v27 = vpop.permute.xlu2 %473 }
 0x10f   : > { %v476_v28 = vsel %vm475_vm11, %v472_v24, %v474_v27 }
 0x110   : > { %v481_v29 = vsel %vm448_vm9, %v476_v28, 0  ;;  %v1172_v28 = vld [vmem:[%s1670_s3 + $0xa] sm:$0x3] }
 0x111   : > { %490 = vmatpush.bf16.msra.mxu1 %v481_v29 }
 0x114   : > { %1160 = vmatmul.msk.bf16.vlgmr.msra.gmra.mxu1 %vm444_vm10, %v439_v30 }
 0x126   : > { %v504_v31 = vpop.permute.xlu1 %503  ;;  %v461_v34 = vpop.f32.mrf.mxu0 }
 0x127   : > { %v509_v32 = vsel %vm448_vm9, %v504_v31, 0 }
 0x128   : > { %518 = vmatpush.bf16.msra.mxu2 %v509_v32 }
 0x12b   : > { %1162 = vmatmul.msk.bf16.vlgmr.msra.gmra.mxu2 %vm444_vm10, %v1161_v33  ;;  %v1168_v33 = vld [vmem:[%s1670_s3 + $0x6] sm:$0x3] }
 0x12e   : > { %v463_v35 = vpop.f32.mrf.mxu0 }
 0x191   : > { %v492_v36 = vpop.f32.mrf.mxu1 }
 0x192   : > { %v493_v38 = vadd.f32 %v492_v36, %v461_v34 }
 0x199   : > { %v494_v37 = vpop.f32.mrf.mxu1 }
 0x1ae   : > { %v520_v39 = vpop.f32.mrf.mxu2 }
 0x1af   : > { %v524_v41 = vadd.f32 %v520_v39, %v493_v38 }
 0x1b1   : > { %v531_v42 = vadd.f32 %v529_v40, %v524_v41 }
 0x1b3   : > { %vm532_vm12 = vcmp.ge.f32.partialorder %v531_v42, 0.0  ;;  %v533_v43 = vmul.f32 0.1, %v531_v42 }
 0x1b5   : > { %v534_v44 = vsel %vm532_vm12, %v531_v42, %v533_v43 }
 0x1b6   : > { %v535_v45 = vsel %vm1468_vm6, %v534_v44, 0.0  ;;  %v522_v46 = vpop.f32.mrf.mxu2 }
 0x1b7   : > { %v536_v47 = vpack.c.bf16 %v535_v45, %v535_v45 }
 0x1b9   : > { %537 = vst.msk [vmem:[#allocation2 + $0x2] sm:$0x3] %vm437_vm8, %v536_v47 }
 0x1c0   : > { %v539_v48 = vld [vmem:[#allocation2] sm:$0xf] }
 0x1c1   : > { %v542_v49 = vld [vmem:[#allocation2 + $0x2] sm:$0x3]  ;;  %563 = vst [vmem:[#allocation1] ss:$4 sm:$0xff] %v539_v48 }
 0x1c2   : > { %v547_v50 = vsel %vm448_vm9, %v542_v49, 0  ;;  %v594_v51 = vld [vmem:[#allocation2 + $0x2] sm:$0x3] }
 0x1c3   : > { %556 = vmatpush.bf16.msra.mxu3 %v547_v50 }
 0x1c6   : > { %1164 = vmatmul.msk.bf16.vlgmr.msra.gmra.mxu3 %vm444_vm10, %v1163_v55  ;;  %v1176_v55 = vld [vmem:[%s1672_s5 + $0x8] sm:$0x3] }
 0x1c8   : > { %v566_v52 = vld.sshfl [vmem:[#allocation1 + $0x8] sm:$0xff pattern:$0x73625140]  ;;  %v564_v53 = vld.sshfl [vmem:[#allocation1] sm:$0xff pattern:$0x73625140] }
 0x1c9   : > { %570 = vrot.lane.b32.xlu2 %v566_v52, %s1353_s16  ;;  %568 = vrot.lane.b32.xlu1 %v564_v53, %s1353_s16  ;;  %596 = vst [vmem:[#allocation1] ss:$4 sm:$0xff] %v594_v51 }
 0x1d0   : > { %v597_v54 = vld.sshfl [vmem:[#allocation1] sm:$0xff pattern:$0x73625140] }
 0x1d1   : > { %599 = vrot.lane.b32.xlu1 %v597_v54, %s1354_s17  ;;  %624 = vperm.xlu2 %1267, %v621_v56   ;;  %v1181_v56 = vld [vmem:[%s1673_s6 + $0x4] sm:$0xf] }
 0x223   : > { %v571_v57 = vpop.permute.xlu2 %570 }
 0x22b   : > { %v625_v6 = vpop.permute.xlu2 %624 }
 0x23b   : > { %v569_v58 = vpop.permute.xlu1 %568 }
 0x23c   : > { %v572_v59 = vsel %vm475_vm11, %v569_v58, %v571_v57 }
 0x23d   : > { %v577_v60 = vsel %vm448_vm9, %v572_v59, 0 }
 0x23e   : > { %586 = vmatpush.bf16.msrb.mxu0 %v577_v60 }
 0x241   : > { %1165 = vmatmul.msk.bf16.vlgmr.msrb.gmra.mxu0 %vm444_vm10, %v538_v61  ;;  %v1175_v61 = vld [vmem:[%s1672_s5 + $0x6] sm:$0x3] }
 0x243   : > { %v600_v62 = vpop.permute.xlu1 %599 }
 0x244   : > { %v605_v63 = vsel %vm448_vm9, %v600_v62, 0 }
 0x245   : > { %614 = vmatpush.bf16.msrb.mxu1 %v605_v63 }
 0x248   : > { %1167 = vmatmul.msk.bf16.vlgmr.msrb.gmra.mxu1 %vm444_vm10, %v1166_v0  ;;  %v1179_v0 = vld [vmem:[%s1672_s5 + $0xa] sm:$0x3] }
 0x249   : > { %v558_v1 = vpop.f32.mrf.mxu3 }
 0x251   : > { %v560_v2 = vpop.f32.mrf.mxu3 }
 0x2be   : > { %v588_v3 = vpop.f32.mrf.mxu0 }
 0x2bf   : > { %v589_v4 = vadd.f32 %v588_v3, %v558_v1 }
 0x2c5   : > { %v616_v5 = vpop.f32.mrf.mxu1 }
 0x2c6   : > { %v620_v7 = vadd.f32 %v616_v5, %v589_v4  ;;  %v590_v8 = vpop.f32.mrf.mxu0 }
 0x2c8   : > { %v627_v9 = vadd.f32 %v625_v6, %v620_v7 }
 0x2ca   : > { %v1526_v10 = vadd.f32 %v627_v9, %v1466_v11 }
 0x2cc   : > { %vm629_vm13 = vcmp.ge.f32.partialorder %v1526_v10, 0.0  ;;  %v630_v13 = vmul.f32 0.1, %v1526_v10 }
 0x2cd   : > { %v618_v14 = vpop.f32.mrf.mxu1 }
 0x2ce   : > { %v631_v15 = vsel %vm629_vm13, %v1526_v10, %v630_v13 }
 0x2cf   : > { %v632_v16 = vsel %vm1468_vm6, %v631_v15, 0.0 }
 0x2d0   : > { %v633_v17 = vpack.c.bf16 %v632_v16, %v632_v16 }
 0x2d2   : > { %634 = vst.msk [vmem:[#allocation2 + $0x2] sm:$0x3] %vm437_vm8, %v633_v17 }
 0x2d9   : > { %v640_v18 = vld [vmem:[#allocation2 + $0x2] sm:$0x3] }
 0x2da   : > { %v637_v19 = vld [vmem:[#allocation2] sm:$0xf]  ;;  %v645_v20 = vsel %vm448_vm9, %v640_v18, 0 }
 0x2db   : > { %661 = vst [vmem:[#allocation1] ss:$4 sm:$0xff] %v637_v19  ;;  %654 = vmatpush.bf16.msrb.mxu2 %v645_v20  ;;  %v693_v11 = vld [vmem:[#allocation2 + $0x2] sm:$0x3] }
 0x2de   : > { %1170 = vmatmul.msk.bf16.vlgmr.msrb.gmra.mxu2 %vm444_vm10, %v1169_v25  ;;  %v1183_v25 = vld [vmem:[%s1670_s3 + $0xe] sm:$0x3] }
 0x2e2   : > { %v664_v21 = vld.sshfl [vmem:[#allocation1 + $0x8] sm:$0xff pattern:$0x73625140]  ;;  %v662_v22 = vld.sshfl [vmem:[#allocation1] sm:$0xff pattern:$0x73625140] }
 0x2e3   : > { %668 = vrot.lane.b32.xlu1 %v664_v21, %s1355_s23  ;;  %666 = vrot.lane.b32.xlu0 %v662_v22, %s1355_s23  ;;  %695 = vst [vmem:[#allocation1] ss:$4 sm:$0xff] %v693_v11 }
 0x2ea   : > { %v696_v24 = vld.sshfl [vmem:[#allocation1] sm:$0xff pattern:$0x73625140] }
 0x2eb   : > { %724 = vperm.xlu0 %1266, %v1174_v23   ;;  %698 = vrot.lane.b32.xlu2 %v696_v24, %s1356_s10  ;;  %v1188_v24 = vld [vmem:[%s1671_s4 + $0x8] sm:$0xf]  ;;  %s1154_s10 = sshll.u32 %s361_s8, 2 }
 0x345   : > { %v699_v26 = vpop.permute.xlu2 %698 }
 0x346   : > { %v704_v27 = vsel %vm448_vm9, %v699_v26, 0 }
 0x347   : > { %713 = vmatpush.bf16.msra.mxu0 %v704_v27 }
 0x34a   : > { %1173 = vmatmul.msk.bf16.vlgmr.msra.gmra.mxu0 %vm444_vm10, %v1172_v28  ;;  %v1186_v28 = vld [vmem:[%s1670_s3 + $0x10] sm:$0x3] }
 0x355   : > { %v669_v29 = vpop.permute.xlu1 %668  ;;  %v667_v30 = vpop.permute.xlu0 %666 }
 0x356   : > { %v671_v31 = vsel %vm670_vm14, %v667_v30, %v669_v29 }
 0x357   : > { %v676_v32 = vsel %vm448_vm9, %v671_v31, 0 }
 0x358   : > { %685 = vmatpush.bf16.msrb.mxu3 %v676_v32 }
 0x35b   : > { %1171 = vmatmul.msk.bf16.vlgmr.msrb.gmra.mxu3 %vm444_vm10, %v1168_v33  ;;  %v1182_v33 = vld [vmem:[%s1670_s3 + $0xc] sm:$0x3] }
 0x35d   : > { %v725_v41 = vpop.permute.xlu0 %724 }
 0x361   : > { %v656_v34 = vpop.f32.mrf.mxu2 }
 0x369   : > { %v658_v35 = vpop.f32.mrf.mxu2 }
 0x3c7   : > { %v715_v36 = vpop.f32.mrf.mxu0 }
 0x3cf   : > { %v717_v37 = vpop.f32.mrf.mxu0 }
 0x3de   : > { %v687_v38 = vpop.f32.mrf.mxu3 }
 0x3df   : > { %v688_v39 = vadd.f32 %v687_v38, %v656_v34 }
 0x3e1   : > { %v719_v40 = vadd.f32 %v715_v36, %v688_v39 }
 0x3e3   : > { %v727_v42 = vadd.f32 %v725_v41, %v719_v40 }
 0x3e5   : > { %vm728_vm15 = vcmp.ge.f32.partialorder %v727_v42, 0.0  ;;  %v729_v43 = vmul.f32 0.1, %v727_v42 }
 0x3e6   : > { %v689_v44 = vpop.f32.mrf.mxu3 }
 0x3e7   : > { %v730_v45 = vsel %vm728_vm15, %v727_v42, %v729_v43 }
 0x3e8   : > { %v731_v46 = vsel %vm1468_vm6, %v730_v45, 0.0 }
 0x3e9   : > { %v732_v47 = vpack.c.bf16 %v731_v46, %v731_v46 }
 0x3eb   : > { %733 = vst.msk [vmem:[#allocation2 + $0x2] sm:$0x3] %vm437_vm8, %v732_v47 }
 0x3f2   : > { %v736_v48 = vld [vmem:[#allocation2] sm:$0xf] }
 0x3f3   : > { %v739_v49 = vld [vmem:[#allocation2 + $0x2] sm:$0x3]  ;;  %760 = vst [vmem:[#allocation1] ss:$4 sm:$0xff] %v736_v48 }
 0x3f4   : > { %v744_v50 = vsel %vm448_vm9, %v739_v49, 0  ;;  %v791_v51 = vld [vmem:[#allocation2 + $0x2] sm:$0x3] }
 0x3f5   : > { %753 = vmatpush.bf16.msra.mxu1 %v744_v50 }
 0x3f8   : > { %1177 = vmatmul.msk.bf16.vlgmr.msra.gmra.mxu1 %vm444_vm10, %v1176_v55  ;;  %v1190_v55 = vld [vmem:[%s1672_s5 + $0xe] sm:$0x3] }
 0x3fa   : > { %v763_v52 = vld.sshfl [vmem:[#allocation1 + $0x8] sm:$0xff pattern:$0x73625140]  ;;  %v761_v53 = vld.sshfl [vmem:[#allocation1] sm:$0xff pattern:$0x73625140] }
 0x3fb   : > { %767 = vrot.lane.b32.xlu2 %v763_v52, %s1353_s16  ;;  %765 = vrot.lane.b32.xlu1 %v761_v53, %s1353_s16  ;;  %793 = vst [vmem:[#allocation1] ss:$4 sm:$0xff] %v791_v51 }
 0x402   : > { %v794_v54 = vld.sshfl [vmem:[#allocation1] sm:$0xff pattern:$0x73625140] }
 0x403   : > { %796 = vrot.lane.b32.xlu0 %v794_v54, %s1354_s17  ;;  %822 = vperm.xlu1 %1268, %v1181_v56  }
 0x455   : > { %v768_v57 = vpop.permute.xlu2 %767 }
 0x46d   : > { %v766_v58 = vpop.permute.xlu1 %765 }
 0x46e   : > { %v769_v59 = vsel %vm475_vm11, %v766_v58, %v768_v57  ;;  %v1193_v58 = vld [vmem:[%s1672_s5 + $0x10] sm:$0x3] }
 0x46f   : > { %v774_v60 = vsel %vm448_vm9, %v769_v59, 0 }
 0x470   : > { %783 = vmatpush.bf16.msra.mxu2 %v774_v60 }
 0x473   : > { %1178 = vmatmul.msk.bf16.vlgmr.msra.gmra.mxu2 %vm444_vm10, %v1175_v61 }
 0x475   : > { %v797_v62 = vpop.permute.xlu0 %796  ;;  %v755_v1 = vpop.f32.mrf.mxu1 }
 0x476   : > { %v802_v63 = vsel %vm448_vm9, %v797_v62, 0  ;;  %v823_v6 = vpop.permute.xlu1 %822 }
 0x477   : > { %811 = vmatpush.bf16.msra.mxu3 %v802_v63  ;;  %v1189_v63 = vld [vmem:[%s1672_s5 + $0xc] sm:$0x3] }
 0x47a   : > { %1180 = vmatmul.msk.bf16.vlgmr.msra.gmra.mxu3 %vm444_vm10, %v1179_v0 }
 0x47d   : > { %v757_v2 = vpop.f32.mrf.mxu1 }
 0x4f6   : > { %v785_v3 = vpop.f32.mrf.mxu2 }
 0x4f7   : > { %v786_v4 = vadd.f32 %v785_v3, %v755_v1 }
 0x4fd   : > { %v813_v5 = vpop.f32.mrf.mxu3 }
 0x4fe   : > { %v817_v7 = vadd.f32 %v813_v5, %v786_v4  ;;  %v787_v8 = vpop.f32.mrf.mxu2 }
 0x500   : > { %v825_v9 = vadd.f32 %v823_v6, %v817_v7 }
 0x502   : > { %v1578_v13 = vadd.f32 %v825_v9, %v1526_v10 }
 0x504   : > { %vm827_vm0 = vcmp.ge.f32.partialorder %v1578_v13, 0.0  ;;  %v828_v14 = vmul.f32 0.1, %v1578_v13 }
 0x505   : > { %v815_v15 = vpop.f32.mrf.mxu3 }
 0x506   : > { %v829_v16 = vsel %vm827_vm0, %v1578_v13, %v828_v14 }
 0x507   : > { %v830_v17 = vsel %vm1468_vm6, %v829_v16, 0.0 }
 0x508   : > { %v831_v18 = vpack.c.bf16 %v830_v17, %v830_v17 }
 0x50a   : > { %832 = vst.msk [vmem:[#allocation2 + $0x2] sm:$0x3] %vm437_vm8, %v831_v18 }
 0x511   : > { %v835_v19 = vld [vmem:[#allocation2] sm:$0xf] }
 0x512   : > { %v838_v20 = vld [vmem:[#allocation2 + $0x2] sm:$0x3]  ;;  %859 = vst [vmem:[#allocation1] ss:$4 sm:$0xff] %v835_v19 }
 0x513   : > { %v843_v11 = vsel %vm448_vm9, %v838_v20, 0  ;;  %v891_v10 = vld [vmem:[#allocation2 + $0x2] sm:$0x3] }
 0x514   : > { %852 = vmatpush.bf16.msrb.mxu0 %v843_v11 }
 0x517   : > { %1184 = vmatmul.msk.bf16.vlgmr.msrb.gmra.mxu0 %vm444_vm10, %v1183_v25 }
 0x519   : > { %v862_v21 = vld.sshfl [vmem:[#allocation1 + $0x8] sm:$0xff pattern:$0x73625140]  ;;  %v860_v22 = vld.sshfl [vmem:[#allocation1] sm:$0xff pattern:$0x73625140] }
 0x51a   : > { %866 = vrot.lane.b32.xlu1 %v862_v21, %s1357_s19  ;;  %864 = vrot.lane.b32.xlu0 %v860_v22, %s1357_s19  ;;  %893 = vst [vmem:[#allocation1] ss:$4 sm:$0xff] %v891_v10  ;;  %s1043_s19 = scalar_lea.hbm %s1674_s7, %s1197_s12  ;;  %s1289_s12 = scalar_lea.hbm %s1674_s7, 8 }
 0x521   : > { %v894_v23 = vld.sshfl [vmem:[#allocation1] sm:$0xff pattern:$0x73625140] }
 0x522   : > { %896 = vrot.lane.b32.xlu2 %v894_v23, %s1358_s20  ;;  %s363_s20 = scalar_lea.vmem [#allocation3], %s1154_s10 }
 0x523   : > { %s1045_s21 = sshll.u32 %s363_s20, 4  ;;  %s1046_s21 = int_to_ptr.vmem [resolvable:$true] %s1045_s21 }
 0x52a   : > { %922 = vperm.xlu2 %1267, %v1188_v24  }
 0x57c   : > { %v897_v26 = vpop.permute.xlu2 %896 }
 0x57d   : > { %v902_v27 = vsel %vm448_vm9, %v897_v26, 0 }
 0x57e   : > { %911 = vmatpush.bf16.msrb.mxu2 %v902_v27 }
 0x581   : > { %1187 = vmatmul.msk.bf16.vlgmr.msrb.gmra.mxu2 %vm444_vm10, %v1186_v28 }
 0x584   : > { %v923_v41 = vpop.permute.xlu2 %922 }
 0x58c   : > { %v867_v29 = vpop.permute.xlu1 %866  ;;  %v865_v30 = vpop.permute.xlu0 %864 }
 0x58d   : > { %v869_v31 = vsel %vm868_vm1, %v865_v30, %v867_v29 }
 0x58e   : > { %v874_v32 = vsel %vm448_vm9, %v869_v31, 0 }
 0x58f   : > { %883 = vmatpush.bf16.msrb.mxu1 %v874_v32 }
 0x592   : > { %1185 = vmatmul.msk.bf16.vlgmr.msrb.gmra.mxu1 %vm444_vm10, %v1182_v33 }
 0x594   : > { %v854_v34 = vpop.f32.mrf.mxu0 }
 0x59c   : > { %v856_v35 = vpop.f32.mrf.mxu0 }
 0x604   : > { %v913_v36 = vpop.f32.mrf.mxu2 }
 0x60c   : > { %v915_v37 = vpop.f32.mrf.mxu2 }
 0x60f   : > { %v885_v38 = vpop.f32.mrf.mxu1 }
 0x610   : > { %v886_v39 = vadd.f32 %v885_v38, %v854_v34 }
 0x612   : > { %v917_v40 = vadd.f32 %v913_v36, %v886_v39 }
 0x614   : > { %v925_v42 = vadd.f32 %v923_v41, %v917_v40 }
 0x616   : > { %vm926_vm2 = vcmp.ge.f32.partialorder %v925_v42, 0.0  ;;  %v927_v43 = vmul.f32 0.1, %v925_v42 }
 0x617   : > { %v887_v44 = vpop.f32.mrf.mxu1 }
 0x618   : > { %v928_v45 = vsel %vm926_vm2, %v925_v42, %v927_v43 }
 0x619   : > { %v929_v46 = vsel %vm1468_vm6, %v928_v45, 0.0 }
 0x61a   : > { %v930_v47 = vpack.c.bf16 %v929_v46, %v929_v46 }
 0x61c   : > { %931 = vst.msk [vmem:[#allocation2 + $0x2] sm:$0x3] %vm437_vm8, %v930_v47 }
 0x623   : > { %v934_v48 = vld [vmem:[#allocation2] sm:$0xf] }
 0x624   : > { %v937_v49 = vld [vmem:[#allocation2 + $0x2] sm:$0x3]  ;;  %958 = vst [vmem:[#allocation1] ss:$4 sm:$0xff] %v934_v48 }
 0x625   : > { %v942_v50 = vsel %vm448_vm9, %v937_v49, 0  ;;  %v989_v51 = vld [vmem:[#allocation2 + $0x2] sm:$0x3] }
 0x626   : > { %951 = vmatpush.bf16.msrb.mxu3 %v942_v50 }
 0x629   : > { %1191 = vmatmul.msk.bf16.vlgmr.msrb.gmra.mxu3 %vm444_vm10, %v1190_v55 }
 0x62b   : > { %v961_v52 = vld.sshfl [vmem:[#allocation1 + $0x8] sm:$0xff pattern:$0x73625140]  ;;  %v959_v53 = vld.sshfl [vmem:[#allocation1] sm:$0xff pattern:$0x73625140] }
 0x62c   : > { %965 = vrot.lane.b32.xlu1 %v961_v52, %s1353_s16  ;;  %963 = vrot.lane.b32.xlu0 %v959_v53, %s1353_s16  ;;  %991 = vst [vmem:[#allocation1] ss:$4 sm:$0xff] %v989_v51  ;;  %s1047_s16 = sshll.u32 %s1043_s19, 4  ;;  %s1048_s16 = int_to_ptr.hbm [resolvable:$true] %s1047_s16 }
 0x633   : > { %v992_v54 = vld.sshfl [vmem:[#allocation1] sm:$0xff pattern:$0x73625140] }
 0x634   : > { %1020 = vperm.xlu0 %1266, %v1195_v12   ;;  %994 = vrot.lane.b32.xlu2 %v992_v54, %s1354_s17  ;;  %s1283_s17 = sshra.s32 %s1048_s16, 4  ;;  %s1284_s17 = int_to_ptr.hbm [resolvable:$true] %s1283_s17 }
 0x635   : > { %s1285_s23 = scalar_lea.hbm %s1284_s17, 4  ;;  %p1290_p1 = scmp.lt.s32.totalorder %s1284_s17, %s1674_s7 }
 0x636   : > { %p1286_p12 = scmp.ne.s32.totalorder %s1284_s17, %s1285_s23  ;;  %p1291_p2 = scmp.lt.s32.totalorder %s1289_s12, %s1285_s23 }
 0x638   : > { %p1287_p13 = pnand %p1286_p12, %p1440_p4  ;;  %p1292_p3 = por %p1291_p2, %p1290_p1 }
 0x63a   : > { %p1288_p0 = pneg %p1287_p13 }
 0x63c   : > { %p1293_p5 = pnand %p1292_p3, %p1288_p0 }
 0x68e   : > { %v995_v56 = vpop.permute.xlu2 %994 }
 0x68f   : > { %v1000_v57 = vsel %vm448_vm9, %v995_v56, 0 }
 0x690   : > { %1009 = vmatpush.bf16.msra.mxu1 %v1000_v57 }
 0x693   : > { %1194 = vmatmul.msk.bf16.vlgmr.msra.gmra.mxu1 %vm444_vm10, %v1193_v58 }
 0x69e   : > { %v966_v59 = vpop.permute.xlu1 %965  ;;  %v964_v60 = vpop.permute.xlu0 %963 }
 0x69f   : > { %v967_v61 = vsel %vm475_vm11, %v964_v60, %v966_v59 }
 0x6a0   : > { %v972_v62 = vsel %vm448_vm9, %v967_v61, 0 }
 0x6a1   : > { %981 = vmatpush.bf16.msra.mxu0 %v972_v62 }
 0x6a4   : > { %1192 = vmatmul.msk.bf16.vlgmr.msra.gmra.mxu0 %vm444_vm10, %v1189_v63 }
 0x6a6   : > { %v1021_v7 = vpop.permute.xlu0 %1020 }
 0x6ac   : > { %v953_v0 = vpop.f32.mrf.mxu3 }
 0x6b4   : > { %v955_v1 = vpop.f32.mrf.mxu3 }
 0x710   : > { %v1011_v2 = vpop.f32.mrf.mxu1 }
 0x718   : > { %v1013_v3 = vpop.f32.mrf.mxu1 }
 0x721   : > { %v983_v4 = vpop.f32.mrf.mxu0 }
 0x722   : > { %v984_v5 = vadd.f32 %v983_v4, %v953_v0 }
 0x724   : > { %v1015_v6 = vadd.f32 %v1011_v2, %v984_v5 }
 0x726   : > { %v1023_v8 = vadd.f32 %v1021_v7, %v1015_v6 }
 0x728   : > { %v1024_v9 = vadd.f32 %v1023_v8, %v1578_v13 }
 0x729   : > { %v985_v14 = vpop.f32.mrf.mxu0 }
 0x72a   : > { %1026 = vrot.lane.b32.xlu1 %v1024_v9, %s1359_s30 }
 0x79c   : > { %v1027_v15 = vpop.permute.xlu1 %1026 }
 0x79d   : > { %1030 = vst.msk [vmem:[%s363_s20] sm:$0xf] %vm1029_vm3, %v1027_v15 }
 0x79e   : > { %1296 = shalt.err (!%p1293_p5)
}
 0x79f   : > { %1200 = dma.vmem_to_hbm [thread:$0]  (%p1440_p4), %s1046_s21, 64, %s1048_s16, %s1032_s22  }
 0x7a0 PF: > { %p1206_p6 = scmp.ge.s32.totalorder %s1347_s29, 2  ;;  %s1059_s8 = sand.u32 1, %s1327_s24  }
 0x7a1   : > { %s1060_s18 = scalar_lea.sflag [#allocation4], %s1059_s8 }
 0x7a2   : > { %p1203_p7 = pnand %p1206_p6, %p1447_p8 }
 0x7a4   : > { %p1204_p9 = pneg %p1203_p7 }
 0x7a6   : > { %1322 = dma.done.wait (%p1204_p9), %s1060_s18, 64  }
 0x7a7   : > { %1324 = vsyncadd (%p1204_p9), %s1060_s18, 4294967232  ;;  %s20_s29 = sadd.s32 1, %s1347_s29   ;;  %s1679_s24 = smov %s1331_s25 }
 0x7a8   : > { %p17_p10 = scmp.ge.s32.totalorder %s20_s29, 4   ;;  %s1680_s25 = smov %s1335_s26 }
 0x7a9   : > { %s1681_s26 = smov %s1453_s14  ;;  %s1682_s27 = smov %s1343_s28 }
 0x7aa   : > { %s1683_s28 = smov %s1685_s9  ;;  %19 = sbr.rel (!%p17_p10) target bundleno = 4 (0x4), region = 109 }
 0x7af   :  { %1066 = vsyncpa [#allocation4], 1 }
 0x7b0   :  { %1068 = vsyncpa [#allocation4 + $0x1], 1 }

// kernel: resblock1.1
= control target key start
LH: loop header
LB: loop body
LE: loop exit
PB: predicated region body
PF: predicated region fallthrough
CT: control target
= control target key end

     0   :  { %12 = vsyncpa [#allocation4], 0  ;;  %s1667_s0 = inlined_call_operand.vmem [shape: f32[2,4,16], index: 0, kind: input, shape index: {}, may-alias: {0,1,2}]   ;;  %s1668_s1 = inlined_call_operand.vmem [shape: f32[2,4,16], index: 1, kind: input, shape index: {}, may-alias: {0,1,2}]   ;;  %s1669_s2 = inlined_call_operand.vmem [shape: f32[2,4,16], index: 2, kind: input, shape index: {}, may-alias: {0,1,2}]   ;;  %s1670_s3 = inlined_call_operand.vmem [shape: bf16[3,3,4,4], index: 3, kind: input, shape index: {}]   ;;  %s1671_s4 = inlined_call_operand.vmem [shape: f32[3,4,1], index: 4, kind: input, shape index: {}]   ;;  %s1672_s5 = inlined_call_operand.vmem [shape: bf16[3,3,4,4], index: 5, kind: input, shape index: {}]   ;;  %s1673_s6 = inlined_call_operand.vmem [shape: f32[3,4,1], index: 6, kind: input, shape index: {}]   ;;  %s1674_s7 = inlined_call_operand.hbm [shape: f32[2,4,16], index: 7, kind: output, shape index: {}]  }
   0x1   :  { %14 = vsyncpa [#allocation4 + $0x1], 0  ;;  %s1400_s24 = smov 0   ;;  %s1402_s25 = smov 0  }
   0x2   :  { %s1404_s26 = smov 0   ;;  %s1406_s27 = smov 0  }
   0x3   :  { %s1408_s28 = smov 0   ;;  %s1410_s29 = smov 0  }
   0x4 LB: > { %s1149_s30 = sadd.s32 4294967295, %s1347_s29   ;;  %s1150_s8 = sadd.s32 4294967294, %s1347_s29   ;;  %s1347_s29 = sphi %s1410_s29, %s20_s29   ;;  %s1343_s28 = sphi %s1408_s28, %s1683_s28   ;;  %s1339_s27 = sphi %s1406_s27, %s1682_s27   ;;  %s1335_s26 = sphi %s1404_s26, %s1681_s26   ;;  %s1331_s25 = sphi %s1402_s25, %s1680_s25   ;;  %s1327_s24 = sphi %s1400_s24, %s1679_s24  }
   0x5   : > { %s32_s9 = sadd.s32 1, %s1343_s28  ;;  %s221_s10 = sadd.s32 1, %s1335_s26 }
   0x6   : > { %p34_p0 = scmp.ge.s32.totalorder %s32_s9, 2  ;;  %p231_p1 = scmp.ne.s32.totalorder %s1335_s26, %s1331_s25 }
   0x7   : > { %p232_p2 = scmp.eq.s32.totalorder %s1149_s30, 1  ;;  %p237_p3 = scmp.ne.s32.totalorder %s1331_s25, %s1327_s24 }
   0x8   : > { %s1685_s9 = smov (%p34_p0, %s32_s9), 0  ;;  %p238_p5 = scmp.eq.s32.totalorder %s1150_s8, 1 }
   0x9   : > { %p1440_p4 = por %p232_p2, %p231_p1  ;;  %s216_s12 = ssub.s32 %s1343_s28, %s1685_s9 }
   0xa   : > { %p1153_p6 = scmp.ge.s32.totalorder %s1347_s29, 1  ;;  %p219_p7 = scmp.eq.s32.totalorder %s216_s12, 0 }
   0xb   : > { %p1447_p8 = por %p238_p5, %p237_p3  ;;  %p310_p9 = scmp.lt.s32.totalorder %s1347_s29, 3 }
   0xc   : > { %s1453_s14 = scalar_select %p219_p7, %s1335_s26, %s221_s10  }
   0xd   : > { %p311_p10 = pnand %p1153_p6, %p310_p9 }
   0xe   : > { %p364_p11 = scmp.lt.s32.totalorder (!%p311_p10), %s1339_s27, 1  ;;  %s1349_s23 = smov (!%p311_p10), 124  }
   0xf   : > { %314 = sbr.rel (%p311_p10) target bundleno = 1952 (0x7a0), region = 48  ;;  %s1350_s30 = smov (!%p311_p10), 28  }
  0x10   : > { %s1354_s17 = smov (!%p311_p10), 127   ;;  %s1356_s10 = smov (!%p311_p10), 125  }
  0x11   : > { %s1358_s20 = smov (!%p311_p10), 123   ;;  %s361_s8 = sand.u32 (!%p311_p10), 1, %s1331_s25  }
  0x14   : > { %s365_s15 = scalar_select %p364_p11, %s1339_s27, 1  ;;  %vm398_vm0 = vcmask 1042392   ;;  %vm400_vm1 = vcmask 361792   ;;  %v1352_v3 = vmov 0   ;;  %v421_v4 = vlaneseq  ;;  %v1158_v25 = vld [vmem:[%s1670_s3 + $0x2] sm:$0x3] }
  0x15   : > { %399 = vst.msk [vmem:[#allocation2] sm:$0x3] %vm398_vm0, %v1352_v3  ;;  %1266 = vset.pattern.permute.xlu0 %v1352_v3  ;;  %1267 = vset.pattern.permute.xlu2 %v1352_v3  ;;  %vm417_vm2 = vcmask 97280   ;;  %vm419_vm3 = vcmask 228352   ;;  %vm437_vm8 = vcmask 320512   ;;  %vm448_vm9 = vcmask 1041408  }
  0x16   : > { %s1155_s16 = sshll.u32 %s365_s15, 2  ;;  %s1351_s15 = smov 12   ;;  %401 = vst.msk [vmem:[#allocation2 + $0x2] sm:$0x3] %vm400_vm1, %v1352_v3  ;;  %1268 = vset.pattern.permute.xlu1 %v1352_v3  ;;  %v422_v6 = vand.u32 127, %v421_v4  ;;  %vm444_vm10 = vcmask 31744  }
  0x17   : > { %s380_s19 = scalar_lea.vmem %s1668_s1, %s1155_s16  ;;  %s393_s22 = scalar_lea.vmem %s1669_s2, %s1155_s16  ;;  %v525_v26 = vld [vmem:[%s1671_s4] sm:$0xf]  ;;  %vm475_vm11 = vcmask 7168   ;;  %v1161_v33 = vld [vmem:[%s1670_s3 + $0x4] sm:$0x3]  ;;  %vm670_vm14 = vcmask 23552  }
  0x18   : > { %v402_v0 = vld [vmem:[%s380_s19] sm:$0xf]  ;;  %s370_s12 = scalar_lea.vmem %s1667_s0, %s1155_s16  ;;  %v426_v7 = vadd.s32 4294967284, %v422_v6  ;;  %s1353_s16 = smov 1   ;;  %vm868_vm1 = vcmask 39936  }
  0x19   : > { %406 = vrot.lane.b32.xlu0 %v402_v0, %s1349_s23  ;;  %v404_v1 = vld [vmem:[%s393_s22] sm:$0xf]  ;;  %v1166_v0 = vld [vmem:[%s1672_s5 + $0x4] sm:$0x3]  ;;  %s1355_s23 = smov 3   ;;  %s1357_s19 = smov 5  }
  0x1a   : > { %414 = vrot.lane.b32.xlu1 %v404_v1, %s1350_s30  ;;  %v403_v2 = vld [vmem:[%s370_s12] sm:$0xf]  ;;  %vm427_vm4 = vcmp.ge.s32.totalorder %v426_v7, 0  ;;  %vm428_vm5 = vcmp.lt.s32.totalorder %v426_v7, 16  ;;  %v1195_v12 = vld [vmem:[%s1673_s6 + $0x8] sm:$0xf] }
  0x1b   : > { %vm1468_vm6 = vmand %vm427_vm4, %vm428_vm5  ;;  %v439_v30 = vld [vmem:[%s1670_s3] sm:$0x3]  ;;  %v1163_v55 = vld [vmem:[%s1672_s5 + $0x2] sm:$0x3]  ;;  %s1359_s30 = smov 116   ;;  %s1197_s12 = sshll.u32 %s1339_s27, 2 }
  0x1c   : > { %v621_v56 = vld [vmem:[%s1673_s6] sm:$0xf]  ;;  %s1032_s22 = scalar_lea.sflag [#allocation4], %s361_s8 }
  0x1d   : > { %v538_v61 = vld [vmem:[%s1672_s5] sm:$0x3] }
  0x21   : > { %410 = vrot.lane.b32.xlu0 %v403_v2, %s1351_s15 }
  0x29   : > { %528 = vperm.xlu0 %1266, %v525_v26  }
  0x8b   : > { %v407_v5 = vpop.permute.xlu0 %406 }
  0x8c   : > { %v415_v8 = vpop.permute.xlu1 %414 }
  0x93   : > { %v411_v9 = vpop.permute.xlu0 %410 }
  0x94   : > { %v418_v10 = vsel %vm417_vm2, %v407_v5, %v411_v9 }
  0x95   : > { %v1466_v11 = vsel %vm419_vm3, %v418_v10, %v415_v8  ;;  %vm1029_vm3 = vcmask 125952  }
  0x96   : > { %vm430_vm7 = vcmp.ge.f32.partialorder %v1466_v11, 0.0  ;;  %v431_v13 = vmul.f32 0.1, %v1466_v11 }
  0x98   : > { %v432_v14 = vsel %vm430_vm7, %v1466_v11, %v431_v13 }
  0x99   : > { %v435_v15 = vsel %vm1468_vm6, %v432_v14, 0.0 }
  0x9a   : > { %v436_v16 = vpack.c.bf16 %v435_v15, %v435_v15 }
  0x9b   : > { %v529_v40 = vpop.permute.xlu0 %528 }
  0x9c   : > { %438 = vst.msk [vmem:[#allocation2 + $0x2] sm:$0x3] %vm437_vm8, %v436_v16 }
  0xa3   : > { %v440_v17 = vld [vmem:[#allocation2] sm:$0xf] }
  0xa4   : > { %v443_v18 = vld [vmem:[#allocation2 + $0x2] sm:$0x3]  ;;  %466 = vst [vmem:[#allocation1] ss:$4 sm:$0xff] %v440_v17 }
  0xa5   : > { %v450_v19 = vsel %vm448_vm9, %v443_v18, 0  ;;  %v498_v20 = vld [vmem:[#allocation2 + $0x2] sm:$0x3] }
  0xa6   : > { %459 = vmatpush.bf16.msra.mxu0 %v450_v19 }
  0xa9   : > { %1159 = vmatmul.msk.bf16.vlgmr.msra.gmra.mxu0 %vm444_vm10, %v1158_v25  ;;  %v1169_v25 = vld [vmem:[%s1670_s3 + $0x8] sm:$0x3] }
  0xab   : > { %v467_v21 = vld.sshfl [vmem:[#allocation1] sm:$0xff pattern:$0x73625140]  ;;  %v469_v22 = vld.sshfl [vmem:[#allocation1 + $0x8] sm:$0xff pattern:$0x73625140] }
  0xac   : > { %471 = vrot.lane.b32.xlu2 %v467_v21, %s1353_s16  ;;  %500 = vst [vmem:[#allocation1] ss:$4 sm:$0xff] %v498_v20 }
  0xb3   : > { %v501_v23 = vld.sshfl [vmem:[#allocation1] sm:$0xff pattern:$0x73625140] }
  0xb4   : > { %473 = vrot.lane.b32.xlu2 %v469_v22, %s1353_s16  ;;  %503 = vrot.lane.b32.xlu1 %v501_v23, %s1354_s17  ;;  %v1174_v23 = vld [vmem:[%s1671_s4 + $0x4] sm:$0xf] }
 0x106   : > { %v472_v24 = vpop.permute.xlu2 %471 }
 0x10e   : > { %v474_v27 = vpop.permute.xlu2 %473 }
 0x10f   : > { %v476_v28 = vsel %vm475_vm11, %v472_v24, %v474_v27 }
 0x110   : > { %v481_v29 = vsel %vm448_vm9, %v476_v28, 0  ;;  %v1172_v28 = vld [vmem:[%s1670_s3 + $0xa] sm:$0x3] }
 0x111   : > { %490 = vmatpush.bf16.msra.mxu1 %v481_v29 }
 0x114   : > { %1160 = vmatmul.msk.bf16.vlgmr.msra.gmra.mxu1 %vm444_vm10, %v439_v30 }
 0x126   : > { %v504_v31 = vpop.permute.xlu1 %503  ;;  %v461_v34 = vpop.f32.mrf.mxu0 }
 0x127   : > { %v509_v32 = vsel %vm448_vm9, %v504_v31, 0 }
 0x128   : > { %518 = vmatpush.bf16.msra.mxu2 %v509_v32 }
 0x12b   : > { %1162 = vmatmul.msk.bf16.vlgmr.msra.gmra.mxu2 %vm444_vm10, %v1161_v33  ;;  %v1168_v33 = vld [vmem:[%s1670_s3 + $0x6] sm:$0x3] }
 0x12e   : > { %v463_v35 = vpop.f32.mrf.mxu0 }
 0x191   : > { %v492_v36 = vpop.f32.mrf.mxu1 }
 0x192   : > { %v493_v38 = vadd.f32 %v492_v36, %v461_v34 }
 0x199   : > { %v494_v37 = vpop.f32.mrf.mxu1 }
 0x1ae   : > { %v520_v39 = vpop.f32.mrf.mxu2 }
 0x1af   : > { %v524_v41 = vadd.f32 %v520_v39, %v493_v38 }
 0x1b1   : > { %v531_v42 = vadd.f32 %v529_v40, %v524_v41 }
 0x1b3   : > { %vm532_vm12 = vcmp.ge.f32.partialorder %v531_v42, 0.0  ;;  %v533_v43 = vmul.f32 0.1, %v531_v42 }
 0x1b5   : > { %v534_v44 = vsel %vm532_vm12, %v531_v42, %v533_v43 }
 0x1b6   : > { %v535_v45 = vsel %vm1468_vm6, %v534_v44, 0.0  ;;  %v522_v46 = vpop.f32.mrf.mxu2 }
 0x1b7   : > { %v536_v47 = vpack.c.bf16 %v535_v45, %v535_v45 }
 0x1b9   : > { %537 = vst.msk [vmem:[#allocation2 + $0x2] sm:$0x3] %vm437_vm8, %v536_v47 }
 0x1c0   : > { %v539_v48 = vld [vmem:[#allocation2] sm:$0xf] }
 0x1c1   : > { %v542_v49 = vld [vmem:[#allocation2 + $0x2] sm:$0x3]  ;;  %563 = vst [vmem:[#allocation1] ss:$4 sm:$0xff] %v539_v48 }
 0x1c2   : > { %v547_v50 = vsel %vm448_vm9, %v542_v49, 0  ;;  %v594_v51 = vld [vmem:[#allocation2 + $0x2] sm:$0x3] }
 0x1c3   : > { %556 = vmatpush.bf16.msra.mxu3 %v547_v50 }
 0x1c6   : > { %1164 = vmatmul.msk.bf16.vlgmr.msra.gmra.mxu3 %vm444_vm10, %v1163_v55  ;;  %v1176_v55 = vld [vmem:[%s1672_s5 + $0x8] sm:$0x3] }
 0x1c8   : > { %v566_v52 = vld.sshfl [vmem:[#allocation1 + $0x8] sm:$0xff pattern:$0x73625140]  ;;  %v564_v53 = vld.sshfl [vmem:[#allocation1] sm:$0xff pattern:$0x73625140] }
 0x1c9   : > { %570 = vrot.lane.b32.xlu2 %v566_v52, %s1353_s16  ;;  %568 = vrot.lane.b32.xlu1 %v564_v53, %s1353_s16  ;;  %596 = vst [vmem:[#allocation1] ss:$4 sm:$0xff] %v594_v51 }
 0x1d0   : > { %v597_v54 = vld.sshfl [vmem:[#allocation1] sm:$0xff pattern:$0x73625140] }
 0x1d1   : > { %599 = vrot.lane.b32.xlu1 %v597_v54, %s1354_s17  ;;  %624 = vperm.xlu2 %1267, %v621_v56   ;;  %v1181_v56 = vld [vmem:[%s1673_s6 + $0x4] sm:$0xf] }
 0x223   : > { %v571_v57 = vpop.permute.xlu2 %570 }
 0x22b   : > { %v625_v6 = vpop.permute.xlu2 %624 }
 0x23b   : > { %v569_v58 = vpop.permute.xlu1 %568 }
 0x23c   : > { %v572_v59 = vsel %vm475_vm11, %v569_v58, %v571_v57 }
 0x23d   : > { %v577_v60 = vsel %vm448_vm9, %v572_v59, 0 }
 0x23e   : > { %586 = vmatpush.bf16.msrb.mxu0 %v577_v60 }
 0x241   : > { %1165 = vmatmul.msk.bf16.vlgmr.msrb.gmra.mxu0 %vm444_vm10, %v538_v61  ;;  %v1175_v61 = vld [vmem:[%s1672_s5 + $0x6] sm:$0x3] }
 0x243   : > { %v600_v62 = vpop.permute.xlu1 %599 }
 0x244   : > { %v605_v63 = vsel %vm448_vm9, %v600_v62, 0 }
 0x245   : > { %614 = vmatpush.bf16.msrb.mxu1 %v605_v63 }
 0x248   : > { %1167 = vmatmul.msk.bf16.vlgmr.msrb.gmra.mxu1 %vm444_vm10, %v1166_v0  ;;  %v1179_v0 = vld [vmem:[%s1672_s5 + $0xa] sm:$0x3] }
 0x249   : > { %v558_v1 = vpop.f32.mrf.mxu3 }
 0x251   : > { %v560_v2 = vpop.f32.mrf.mxu3 }
 0x2be   : > { %v588_v3 = vpop.f32.mrf.mxu0 }
 0x2bf   : > { %v589_v4 = vadd.f32 %v588_v3, %v558_v1 }
 0x2c5   : > { %v616_v5 = vpop.f32.mrf.mxu1 }
 0x2c6   : > { %v620_v7 = vadd.f32 %v616_v5, %v589_v4  ;;  %v590_v8 = vpop.f32.mrf.mxu0 }
 0x2c8   : > { %v627_v9 = vadd.f32 %v625_v6, %v620_v7 }
 0x2ca   : > { %v1526_v10 = vadd.f32 %v627_v9, %v1466_v11 }
 0x2cc   : > { %vm629_vm13 = vcmp.ge.f32.partialorder %v1526_v10, 0.0  ;;  %v630_v13 = vmul.f32 0.1, %v1526_v10 }
 0x2cd   : > { %v618_v14 = vpop.f32.mrf.mxu1 }
 0x2ce   : > { %v631_v15 = vsel %vm629_vm13, %v1526_v10, %v630_v13 }
 0x2cf   : > { %v632_v16 = vsel %vm1468_vm6, %v631_v15, 0.0 }
 0x2d0   : > { %v633_v17 = vpack.c.bf16 %v632_v16, %v632_v16 }
 0x2d2   : > { %634 = vst.msk [vmem:[#allocation2 + $0x2] sm:$0x3] %vm437_vm8, %v633_v17 }
 0x2d9   : > { %v640_v18 = vld [vmem:[#allocation2 + $0x2] sm:$0x3] }
 0x2da   : > { %v637_v19 = vld [vmem:[#allocation2] sm:$0xf]  ;;  %v645_v20 = vsel %vm448_vm9, %v640_v18, 0 }
 0x2db   : > { %661 = vst [vmem:[#allocation1] ss:$4 sm:$0xff] %v637_v19  ;;  %654 = vmatpush.bf16.msrb.mxu2 %v645_v20  ;;  %v693_v11 = vld [vmem:[#allocation2 + $0x2] sm:$0x3] }
 0x2de   : > { %1170 = vmatmul.msk.bf16.vlgmr.msrb.gmra.mxu2 %vm444_vm10, %v1169_v25  ;;  %v1183_v25 = vld [vmem:[%s1670_s3 + $0xe] sm:$0x3] }
 0x2e2   : > { %v664_v21 = vld.sshfl [vmem:[#allocation1 + $0x8] sm:$0xff pattern:$0x73625140]  ;;  %v662_v22 = vld.sshfl [vmem:[#allocation1] sm:$0xff pattern:$0x73625140] }
 0x2e3   : > { %668 = vrot.lane.b32.xlu1 %v664_v21, %s1355_s23  ;;  %666 = vrot.lane.b32.xlu0 %v662_v22, %s1355_s23  ;;  %695 = vst [vmem:[#allocation1] ss:$4 sm:$0xff] %v693_v11 }
 0x2ea   : > { %v696_v24 = vld.sshfl [vmem:[#allocation1] sm:$0xff pattern:$0x73625140] }
 0x2eb   : > { %724 = vperm.xlu0 %1266, %v1174_v23   ;;  %698 = vrot.lane.b32.xlu2 %v696_v24, %s1356_s10  ;;  %v1188_v24 = vld [vmem:[%s1671_s4 + $0x8] sm:$0xf]  ;;  %s1154_s10 = sshll.u32 %s361_s8, 2 }
 0x345   : > { %v699_v26 = vpop.permute.xlu2 %698 }
 0x346   : > { %v704_v27 = vsel %vm448_vm9, %v699_v26, 0 }
 0x347   : > { %713 = vmatpush.bf16.msra.mxu0 %v704_v27 }
 0x34a   : > { %1173 = vmatmul.msk.bf16.vlgmr.msra.gmra.mxu0 %vm444_vm10, %v1172_v28  ;;  %v1186_v28 = vld [vmem:[%s1670_s3 + $0x10] sm:$0x3] }
 0x355   : > { %v669_v29 = vpop.permute.xlu1 %668  ;;  %v667_v30 = vpop.permute.xlu0 %666 }
 0x356   : > { %v671_v31 = vsel %vm670_vm14, %v667_v30, %v669_v29 }
 0x357   : > { %v676_v32 = vsel %vm448_vm9, %v671_v31, 0 }
 0x358   : > { %685 = vmatpush.bf16.msrb.mxu3 %v676_v32 }
 0x35b   : > { %1171 = vmatmul.msk.bf16.vlgmr.msrb.gmra.mxu3 %vm444_vm10, %v1168_v33  ;;  %v1182_v33 = vld [vmem:[%s1670_s3 + $0xc] sm:$0x3] }
 0x35d   : > { %v725_v41 = vpop.permute.xlu0 %724 }
 0x361   : > { %v656_v34 = vpop.f32.mrf.mxu2 }
 0x369   : > { %v658_v35 = vpop.f32.mrf.mxu2 }
 0x3c7   : > { %v715_v36 = vpop.f32.mrf.mxu0 }
 0x3cf   : > { %v717_v37 = vpop.f32.mrf.mxu0 }
 0x3de   : > { %v687_v38 = vpop.f32.mrf.mxu3 }
 0x3df   : > { %v688_v39 = vadd.f32 %v687_v38, %v656_v34 }
 0x3e1   : > { %v719_v40 = vadd.f32 %v715_v36, %v688_v39 }
 0x3e3   : > { %v727_v42 = vadd.f32 %v725_v41, %v719_v40 }
 0x3e5   : > { %vm728_vm15 = vcmp.ge.f32.partialorder %v727_v42, 0.0  ;;  %v729_v43 = vmul.f32 0.1, %v727_v42 }
 0x3e6   : > { %v689_v44 = vpop.f32.mrf.mxu3 }
 0x3e7   : > { %v730_v45 = vsel %vm728_vm15, %v727_v42, %v729_v43 }
 0x3e8   : > { %v731_v46 = vsel %vm1468_vm6, %v730_v45, 0.0 }
 0x3e9   : > { %v732_v47 = vpack.c.bf16 %v731_v46, %v731_v46 }
 0x3eb   : > { %733 = vst.msk [vmem:[#allocation2 + $0x2] sm:$0x3] %vm437_vm8, %v732_v47 }
 0x3f2   : > { %v736_v48 = vld [vmem:[#allocation2] sm:$0xf] }
 0x3f3   : > { %v739_v49 = vld [vmem:[#allocation2 + $0x2] sm:$0x3]  ;;  %760 = vst [vmem:[#allocation1] ss:$4 sm:$0xff] %v736_v48 }
 0x3f4   : > { %v744_v50 = vsel %vm448_vm9, %v739_v49, 0  ;;  %v791_v51 = vld [vmem:[#allocation2 + $0x2] sm:$0x3] }
 0x3f5   : > { %753 = vmatpush.bf16.msra.mxu1 %v744_v50 }
 0x3f8   : > { %1177 = vmatmul.msk.bf16.vlgmr.msra.gmra.mxu1 %vm444_vm10, %v1176_v55  ;;  %v1190_v55 = vld [vmem:[%s1672_s5 + $0xe] sm:$0x3] }
 0x3fa   : > { %v763_v52 = vld.sshfl [vmem:[#allocation1 + $0x8] sm:$0xff pattern:$0x73625140]  ;;  %v761_v53 = vld.sshfl [vmem:[#allocation1] sm:$0xff pattern:$0x73625140] }
 0x3fb   : > { %767 = vrot.lane.b32.xlu2 %v763_v52, %s1353_s16  ;;  %765 = vrot.lane.b32.xlu1 %v761_v53, %s1353_s16  ;;  %793 = vst [vmem:[#allocation1] ss:$4 sm:$0xff] %v791_v51 }
 0x402   : > { %v794_v54 = vld.sshfl [vmem:[#allocation1] sm:$0xff pattern:$0x73625140] }
 0x403   : > { %796 = vrot.lane.b32.xlu0 %v794_v54, %s1354_s17  ;;  %822 = vperm.xlu1 %1268, %v1181_v56  }
 0x455   : > { %v768_v57 = vpop.permute.xlu2 %767 }
 0x46d   : > { %v766_v58 = vpop.permute.xlu1 %765 }
 0x46e   : > { %v769_v59 = vsel %vm475_vm11, %v766_v58, %v768_v57  ;;  %v1193_v58 = vld [vmem:[%s1672_s5 + $0x10] sm:$0x3] }
 0x46f   : > { %v774_v60 = vsel %vm448_vm9, %v769_v59, 0 }
 0x470   : > { %783 = vmatpush.bf16.msra.mxu2 %v774_v60 }
 0x473   : > { %1178 = vmatmul.msk.bf16.vlgmr.msra.gmra.mxu2 %vm444_vm10, %v1175_v61 }
 0x475   : > { %v797_v62 = vpop.permute.xlu0 %796  ;;  %v755_v1 = vpop.f32.mrf.mxu1 }
 0x476   : > { %v802_v63 = vsel %vm448_vm9, %v797_v62, 0  ;;  %v823_v6 = vpop.permute.xlu1 %822 }
 0x477   : > { %811 = vmatpush.bf16.msra.mxu3 %v802_v63  ;;  %v1189_v63 = vld [vmem:[%s1672_s5 + $0xc] sm:$0x3] }
 0x47a   : > { %1180 = vmatmul.msk.bf16.vlgmr.msra.gmra.mxu3 %vm444_vm10, %v1179_v0 }
 0x47d   : > { %v757_v2 = vpop.f32.mrf.mxu1 }
 0x4f6   : > { %v785_v3 = vpop.f32.mrf.mxu2 }
 0x4f7   : > { %v786_v4 = vadd.f32 %v785_v3, %v755_v1 }
 0x4fd   : > { %v813_v5 = vpop.f32.mrf.mxu3 }
 0x4fe   : > { %v817_v7 = vadd.f32 %v813_v5, %v786_v4  ;;  %v787_v8 = vpop.f32.mrf.mxu2 }
 0x500   : > { %v825_v9 = vadd.f32 %v823_v6, %v817_v7 }
 0x502   : > { %v1578_v13 = vadd.f32 %v825_v9, %v1526_v10 }
 0x504   : > { %vm827_vm0 = vcmp.ge.f32.partialorder %v1578_v13, 0.0  ;;  %v828_v14 = vmul.f32 0.1, %v1578_v13 }
 0x505   : > { %v815_v15 = vpop.f32.mrf.mxu3 }
 0x506   : > { %v829_v16 = vsel %vm827_vm0, %v1578_v13, %v828_v14 }
 0x507   : > { %v830_v17 = vsel %vm1468_vm6, %v829_v16, 0.0 }
 0x508   : > { %v831_v18 = vpack.c.bf16 %v830_v17, %v830_v17 }
 0x50a   : > { %832 = vst.msk [vmem:[#allocation2 + $0x2] sm:$0x3] %vm437_vm8, %v831_v18 }
 0x511   : > { %v835_v19 = vld [vmem:[#allocation2] sm:$0xf] }
 0x512   : > { %v838_v20 = vld [vmem:[#allocation2 + $0x2] sm:$0x3]  ;;  %859 = vst [vmem:[#allocation1] ss:$4 sm:$0xff] %v835_v19 }
 0x513   : > { %v843_v11 = vsel %vm448_vm9, %v838_v20, 0  ;;  %v891_v10 = vld [vmem:[#allocation2 + $0x2] sm:$0x3] }
 0x514   : > { %852 = vmatpush.bf16.msrb.mxu0 %v843_v11 }
 0x517   : > { %1184 = vmatmul.msk.bf16.vlgmr.msrb.gmra.mxu0 %vm444_vm10, %v1183_v25 }
 0x519   : > { %v862_v21 = vld.sshfl [vmem:[#allocation1 + $0x8] sm:$0xff pattern:$0x73625140]  ;;  %v860_v22 = vld.sshfl [vmem:[#allocation1] sm:$0xff pattern:$0x73625140] }
 0x51a   : > { %866 = vrot.lane.b32.xlu1 %v862_v21, %s1357_s19  ;;  %864 = vrot.lane.b32.xlu0 %v860_v22, %s1357_s19  ;;  %893 = vst [vmem:[#allocation1] ss:$4 sm:$0xff] %v891_v10  ;;  %s1043_s19 = scalar_lea.hbm %s1674_s7, %s1197_s12  ;;  %s1289_s12 = scalar_lea.hbm %s1674_s7, 8 }
 0x521   : > { %v894_v23 = vld.sshfl [vmem:[#allocation1] sm:$0xff pattern:$0x73625140] }
 0x522   : > { %896 = vrot.lane.b32.xlu2 %v894_v23, %s1358_s20  ;;  %s363_s20 = scalar_lea.vmem [#allocation3], %s1154_s10 }
 0x523   : > { %s1045_s21 = sshll.u32 %s363_s20, 4  ;;  %s1046_s21 = int_to_ptr.vmem [resolvable:$true] %s1045_s21 }
 0x52a   : > { %922 = vperm.xlu2 %1267, %v1188_v24  }
 0x57c   : > { %v897_v26 = vpop.permute.xlu2 %896 }
 0x57d   : > { %v902_v27 = vsel %vm448_vm9, %v897_v26, 0 }
 0x57e   : > { %911 = vmatpush.bf16.msrb.mxu2 %v902_v27 }
 0x581   : > { %1187 = vmatmul.msk.bf16.vlgmr.msrb.gmra.mxu2 %vm444_vm10, %v1186_v28 }
 0x584   : > { %v923_v41 = vpop.permute.xlu2 %922 }
 0x58c   : > { %v867_v29 = vpop.permute.xlu1 %866  ;;  %v865_v30 = vpop.permute.xlu0 %864 }
 0x58d   : > { %v869_v31 = vsel %vm868_vm1, %v865_v30, %v867_v29 }
 0x58e   : > { %v874_v32 = vsel %vm448_vm9, %v869_v31, 0 }
 0x58f   : > { %883 = vmatpush.bf16.msrb.mxu1 %v874_v32 }
 0x592   : > { %1185 = vmatmul.msk.bf16.vlgmr.msrb.gmra.mxu1 %vm444_vm10, %v1182_v33 }
 0x594   : > { %v854_v34 = vpop.f32.mrf.mxu0 }
 0x59c   : > { %v856_v35 = vpop.f32.mrf.mxu0 }
 0x604   : > { %v913_v36 = vpop.f32.mrf.mxu2 }
 0x60c   : > { %v915_v37 = vpop.f32.mrf.mxu2 }
 0x60f   : > { %v885_v38 = vpop.f32.mrf.mxu1 }
 0x610   : > { %v886_v39 = vadd.f32 %v885_v38, %v854_v34 }
 0x612   : > { %v917_v40 = vadd.f32 %v913_v36, %v886_v39 }
 0x614   : > { %v925_v42 = vadd.f32 %v923_v41, %v917_v40 }
 0x616   : > { %vm926_vm2 = vcmp.ge.f32.partialorder %v925_v42, 0.0  ;;  %v927_v43 = vmul.f32 0.1, %v925_v42 }
 0x617   : > { %v887_v44 = vpop.f32.mrf.mxu1 }
 0x618   : > { %v928_v45 = vsel %vm926_vm2, %v925_v42, %v927_v43 }
 0x619   : > { %v929_v46 = vsel %vm1468_vm6, %v928_v45, 0.0 }
 0x61a   : > { %v930_v47 = vpack.c.bf16 %v929_v46, %v929_v46 }
 0x61c   : > { %931 = vst.msk [vmem:[#allocation2 + $0x2] sm:$0x3] %vm437_vm8, %v930_v47 }
 0x623   : > { %v934_v48 = vld [vmem:[#allocation2] sm:$0xf] }
 0x624   : > { %v937_v49 = vld [vmem:[#allocation2 + $0x2] sm:$0x3]  ;;  %958 = vst [vmem:[#allocation1] ss:$4 sm:$0xff] %v934_v48 }
 0x625   : > { %v942_v50 = vsel %vm448_vm9, %v937_v49, 0  ;;  %v989_v51 = vld [vmem:[#allocation2 + $0x2] sm:$0x3] }
 0x626   : > { %951 = vmatpush.bf16.msrb.mxu3 %v942_v50 }
 0x629   : > { %1191 = vmatmul.msk.bf16.vlgmr.msrb.gmra.mxu3 %vm444_vm10, %v1190_v55 }
 0x62b   : > { %v961_v52 = vld.sshfl [vmem:[#allocation1 + $0x8] sm:$0xff pattern:$0x73625140]  ;;  %v959_v53 = vld.sshfl [vmem:[#allocation1] sm:$0xff pattern:$0x73625140] }
 0x62c   : > { %965 = vrot.lane.b32.xlu1 %v961_v52, %s1353_s16  ;;  %963 = vrot.lane.b32.xlu0 %v959_v53, %s1353_s16  ;;  %991 = vst [vmem:[#allocation1] ss:$4 sm:$0xff] %v989_v51  ;;  %s1047_s16 = sshll.u32 %s1043_s19, 4  ;;  %s1048_s16 = int_to_ptr.hbm [resolvable:$true] %s1047_s16 }
 0x633   : > { %v992_v54 = vld.sshfl [vmem:[#allocation1] sm:$0xff pattern:$0x73625140] }
 0x634   : > { %1020 = vperm.xlu0 %1266, %v1195_v12   ;;  %994 = vrot.lane.b32.xlu2 %v992_v54, %s1354_s17  ;;  %s1283_s17 = sshra.s32 %s1048_s16, 4  ;;  %s1284_s17 = int_to_ptr.hbm [resolvable:$true] %s1283_s17 }
 0x635   : > { %s1285_s23 = scalar_lea.hbm %s1284_s17, 4  ;;  %p1290_p1 = scmp.lt.s32.totalorder %s1284_s17, %s1674_s7 }
 0x636   : > { %p1286_p12 = scmp.ne.s32.totalorder %s1284_s17, %s1285_s23  ;;  %p1291_p2 = scmp.lt.s32.totalorder %s1289_s12, %s1285_s23 }
 0x638   : > { %p1287_p13 = pnand %p1286_p12, %p1440_p4  ;;  %p1292_p3 = por %p1291_p2, %p1290_p1 }
 0x63a   : > { %p1288_p0 = pneg %p1287_p13 }
 0x63c   : > { %p1293_p5 = pnand %p1292_p3, %p1288_p0 }
 0x68e   : > { %v995_v56 = vpop.permute.xlu2 %994 }
 0x68f   : > { %v1000_v57 = vsel %vm448_vm9, %v995_v56, 0 }
 0x690   : > { %1009 = vmatpush.bf16.msra.mxu1 %v1000_v57 }
 0x693   : > { %1194 = vmatmul.msk.bf16.vlgmr.msra.gmra.mxu1 %vm444_vm10, %v1193_v58 }
 0x69e   : > { %v966_v59 = vpop.permute.xlu1 %965  ;;  %v964_v60 = vpop.permute.xlu0 %963 }
 0x69f   : > { %v967_v61 = vsel %vm475_vm11, %v964_v60, %v966_v59 }
 0x6a0   : > { %v972_v62 = vsel %vm448_vm9, %v967_v61, 0 }
 0x6a1   : > { %981 = vmatpush.bf16.msra.mxu0 %v972_v62 }
 0x6a4   : > { %1192 = vmatmul.msk.bf16.vlgmr.msra.gmra.mxu0 %vm444_vm10, %v1189_v63 }
 0x6a6   : > { %v1021_v7 = vpop.permute.xlu0 %1020 }
 0x6ac   : > { %v953_v0 = vpop.f32.mrf.mxu3 }
 0x6b4   : > { %v955_v1 = vpop.f32.mrf.mxu3 }
 0x710   : > { %v1011_v2 = vpop.f32.mrf.mxu1 }
 0x718   : > { %v1013_v3 = vpop.f32.mrf.mxu1 }
 0x721   : > { %v983_v4 = vpop.f32.mrf.mxu0 }
 0x722   : > { %v984_v5 = vadd.f32 %v983_v4, %v953_v0 }
 0x724   : > { %v1015_v6 = vadd.f32 %v1011_v2, %v984_v5 }
 0x726   : > { %v1023_v8 = vadd.f32 %v1021_v7, %v1015_v6 }
 0x728   : > { %v1024_v9 = vadd.f32 %v1023_v8, %v1578_v13 }
 0x729   : > { %v985_v14 = vpop.f32.mrf.mxu0 }
 0x72a   : > { %1026 = vrot.lane.b32.xlu1 %v1024_v9, %s1359_s30 }
 0x79c   : > { %v1027_v15 = vpop.permute.xlu1 %1026 }
 0x79d   : > { %1030 = vst.msk [vmem:[%s363_s20] sm:$0xf] %vm1029_vm3, %v1027_v15 }
 0x79e   : > { %1296 = shalt.err (!%p1293_p5)
}
 0x79f   : > { %1200 = dma.vmem_to_hbm [thread:$0]  (%p1440_p4), %s1046_s21, 64, %s1048_s16, %s1032_s22  }
 0x7a0 PF: > { %p1206_p6 = scmp.ge.s32.totalorder %s1347_s29, 2  ;;  %s1059_s8 = sand.u32 1, %s1327_s24  }
 0x7a1   : > { %s1060_s18 = scalar_lea.sflag [#allocation4], %s1059_s8 }
 0x7a2   : > { %p1203_p7 = pnand %p1206_p6, %p1447_p8 }
 0x7a4   : > { %p1204_p9 = pneg %p1203_p7 }
 0x7a6   : > { %1322 = dma.done.wait (%p1204_p9), %s1060_s18, 64  }
 0x7a7   : > { %1324 = vsyncadd (%p1204_p9), %s1060_s18, 4294967232  ;;  %s20_s29 = sadd.s32 1, %s1347_s29   ;;  %s1679_s24 = smov %s1331_s25 }
 0x7a8   : > { %p17_p10 = scmp.ge.s32.totalorder %s20_s29, 4   ;;  %s1680_s25 = smov %s1335_s26 }
 0x7a9   : > { %s1681_s26 = smov %s1453_s14  ;;  %s1682_s27 = smov %s1343_s28 }
 0x7aa   : > { %s1683_s28 = smov %s1685_s9  ;;  %19 = sbr.rel (!%p17_p10) target bundleno = 4 (0x4), region = 109 }
 0x7af   :  { %1066 = vsyncpa [#allocation4], 1 }
 0x7b0   :  { %1068 = vsyncpa [#allocation4 + $0x1], 1 }

</bundles_post_ra>
